<compile_context>
chip_gen: v5e
topology: v5e:2x2
jax: 0.10.0
libtpu: 0.0.40
codegen_flags: <defaults>
</compile_context>

<pallas_src>
from functools import partial

import jax
import jax.numpy as jnp
import numpy as np
from jax.experimental import pallas as pl
from jax.experimental.pallas import tpu as pltpu


def _round_up(x, m):
    return (x + m - 1) // m * m


def _pad_axis(a, axis, new_size):
    pad = [(0, 0)] * a.ndim
    pad[axis] = (0, new_size - a.shape[axis])
    return jnp.pad(a, pad)


def _sigmoid_fast(x):
    # 0.5*(1+tanh(x/2)) == 1/(1+exp(-x)); one EUP op (tanh) instead of two (exp + divide).
    return 0.5 * (1.0 + jnp.tanh(0.5 * x))


def _sigmoid_ref(x):
    return 1.0 / (1.0 + jnp.exp(-x))


def _resident_spec(block_shape, index_map):
    """BlockSpec for weights whose block index never changes: single-buffer them."""
    try:
        return pl.BlockSpec(block_shape, index_map, pipeline_mode=pl.Buffered(1))
    except (TypeError, AttributeError):   # older jax without pipeline_mode / Buffered
        return pl.BlockSpec(block_shape, index_map)


def _lstm_kernel(xw_ref, whh_ref, wfc_ref, bfc_ref, o_ref, h_sc, c_sc, *,
                 mxu_dtype, seq_len, time_chunk, has_tail, unroll):
    """Recurrent part only.  xw_ref already holds x @ W_ih + (b_ih + b_hh).

    Grid: (batch_tiles [parallel], time_chunks [arbitrary]).
    xw_ref : (Tc, Bt, 4*Hp)  xw_dtype   current time chunk (input projection pre-computed)
    whh_ref: (Hp, 4*Hp)      mxu_dtype  resident recurrent weights (single-buffered)
    wfc_ref: (Hp, Op)        mxu_dtype  resident FC weights        (single-buffered)
    bfc_ref: (1, Op)         f32
    o_ref  : (Bt, Op)        f32        written only on the last time chunk
    h_sc/c_sc: (Bt, Hp)      f32        state, persists across time chunks
    """
    chunk = pl.program_id(1)
    n_chunks = pl.num_programs(1)
    hp = h_sc.shape[1]

    @pl.when(chunk == 0)
    def _():
        h_sc[...] = jnp.zeros_like(h_sc)
        c_sc[...] = jnp.zeros_like(c_sc)

    w_hh = whh_ref[...]  # load resident weights once per grid step

    # TODO(synk): for tiny batch tiles one could drive the MXU weight-stationary
    # (pltpu.matmul_push_rhs / matmul_acc_lhs / matmul_pop) so W_hh is pushed once per
    # chunk instead of re-streamed per timestep; skipped here for portability.
    def step(t, carry):
        h, c = carry
        # Only the h -> h projection is on the serial critical path.
        gates = xw_ref[t].astype(jnp.float32) + jnp.dot(
            h.astype(mxu_dtype), w_hh, preferred_element_type=jnp.float32)
        # Hp is a multiple of 128 -> every gate slice is a lane-aligned full tile.
        i_g = _sigmoid_fast(gates[:, 0 * hp:1 * hp])
        f_g = _sigmoid_fast(gates[:, 1 * hp:2 * hp])
        g_g = jnp.tanh(gates[:, 2 * hp:3 * hp])
        o_g = _sigmoid_fast(gates[:, 3 * hp:4 * hp])
        c_new = f_g * c + i_g * g_g
        h_new = o_g * jnp.tanh(c_new)
        if has_tail:
            # Padded timesteps (zero xw) must not update state.
            valid = (chunk * time_chunk + t) < seq_len
            h_new = jnp.where(valid, h_new, h)
            c_new = jnp.where(valid, c_new, c)
        return h_new, c_new

    h, c = jax.lax.fori_loop(0, time_chunk, step, (h_sc[...], c_sc[...]), unroll=unroll)
    h_sc[...] = h
    c_sc[...] = c

    @pl.when(chunk == n_chunks - 1)
    def _():
        out = (jnp.dot(h.astype(mxu_dtype), wfc_ref[...],
                       preferred_element_type=jnp.float32)
               + bfc_ref[...])
        o_ref[...] = out.astype(o_ref.dtype)


def lstm_forward(x_btd, w_ih, w_hh, b_ih, b_hh, w_fc, b_fc, *,
                 mxu_dtype=jnp.bfloat16, xw_dtype=None, time_chunk=None,
                 batch_tile=None, vmem_budget_bytes=None):
    """x_btd: [B, T, I] (batch_first, like PyTorch).  Returns [B, O].

    Weights are stored pre-transposed for `x @ W` (PyTorch stores [4H, I] etc.);
    gate order along the 4H axis is (i, f, g, o), same as torch.nn.LSTM.
    """
    B, T, I = x_btd.shape
    H = w_hh.shape[0]          # w_hh: [H, 4H]
    O = w_fc.shape[1]          # w_fc: [H, O]
    if xw_dtype is None:
        xw_dtype = mxu_dtype
    f32 = np.dtype(mxu_dtype) == np.dtype(np.float32)

    Hp = _round_up(H, 128)     # lane tile -> lane-aligned gate slices
    Op = _round_up(O, 128)     # lane-dense output store
    Bp = _round_up(B, 8)       # sublane tile
    if batch_tile is None:
        # Small B stays one tiny tile (latency-bound decode case); large B gets MXU-sized
        # 256-row tiles iterated on the parallel grid axis (feeds v7x's 2nd TensorCore).
        batch_tile = Bp if Bp <= 256 else 256
    batch_tile = _round_up(min(batch_tile, Bp), 8)
    Bp = _round_up(Bp, batch_tile)
    nb = Bp // batch_tile

    # --- VMEM budget -> time_chunk & vmem limit ---------------------------------------
    xw_item = np.dtype(xw_dtype).itemsize
    w_item = np.dtype(mxu_dtype).itemsize
    weight_bytes = Hp * 4 * Hp * w_item + Hp * Op * w_item + Op * 4   # single-buffered
    state_bytes = 2 * batch_tile * Hp * 4 + batch_tile * Op * 4       # h,c scratch + out
    per_step_bytes = 2 * batch_tile * 4 * Hp * xw_item                # xw chunk, 2x buffered
    if vmem_budget_bytes is None:
        vmem_budget_bytes = 48 << 20   # fits v7x's 64 MiB with headroom; raise on v5e/v6e
    if time_chunk is None:
        time_chunk = int((vmem_budget_bytes - weight_bytes - state_bytes) // per_step_bytes)
        time_chunk = max(1, min(T, time_chunk, 64))    # cap unrolled body size
    time_chunk = max(1, min(int(time_chunk), T))
    n_chunks = pl.cdiv(T, time_chunk)
    has_tail = (T % time_chunk) != 0
    # NOTE: fully resident single-buffered W_hh caps practical H (~2048 on v7x); beyond
    # that, K-tile Hp and stream W_hh slices instead.
    vmem_limit = int(min(128 << 20,
                         max(16 << 20,
                             2 * weight_bytes + state_bytes
                             + time_chunk * per_step_bytes + (8 << 20))))

    # --- zero-pad weights per gate block (exact: padded lanes contribute nothing) ------
    w_ih_p = _pad_axis(w_ih.reshape(I, 4, H), 2, Hp).reshape(I, 4 * Hp)
    w_hh_p = _pad_axis(_pad_axis(w_hh.reshape(H, 4, H), 2, Hp), 0, Hp).reshape(Hp, 4 * Hp)
    b_p = _pad_axis((b_ih + b_hh).reshape(4, H), 1, Hp).reshape(1, 4 * Hp)
    w_fc_p = _pad_axis(_pad_axis(w_fc, 0, Hp), 1, Op)
    b_fc_p = _pad_axis(b_fc.reshape(1, O), 1, Op)
    x_p = _pad_axis(x_btd, 0, Bp)                      # [Bp, T, I]

    # --- hoisted, non-recurrent input projection as one big matmul ---------------------
    # 'bti,ig->tbg' produces the time-major layout directly (no extra transpose pass).
    if f32:
        xw = jnp.einsum("bti,ig->tbg", x_p, w_ih_p,
                        preferred_element_type=jnp.float32,
                        precision=jax.lax.Precision.HIGHEST)
    else:
        # Native bf16 MXU path; accumulate in f32.
        xw = jnp.einsum("bti,ig->tbg", x_p.astype(mxu_dtype), w_ih_p.astype(mxu_dtype),
                        preferred_element_type=jnp.float32)
    xw = (xw + b_p).astype(xw_dtype)                   # bias folded in f32, stored xw_dtype
    if has_tail:
        xw = _pad_axis(xw, 0, n_chunks * time_chunk)   # padded steps masked in-kernel

    unroll = True if batch_tile <= 64 else 2           # avoid vreg spills at big tiles

    grid_spec = pltpu.PrefetchScalarGridSpec(
        num_scalar_prefetch=0,
        grid=(nb, n_chunks),
        in_specs=[
            # pre-projected activations, one (batch tile, time chunk) block per grid step
            pl.BlockSpec((time_chunk, batch_tile, 4 * Hp), lambda b, c: (c, b, 0)),
            # resident weights: constant index maps + single buffering
            _resident_spec((Hp, 4 * Hp), lambda b, c: (0, 0)),
            _resident_spec((Hp, Op), lambda b, c: (0, 0)),
            _resident_spec((1, Op), lambda b, c: (0, 0)),
        ],
        out_specs=pl.BlockSpec((batch_tile, Op), lambda b, c: (b, 0)),  # resident over time
        scratch_shapes=[
            pltpu.VMEM((batch_tile, Hp), jnp.float32),  # h state
            pltpu.VMEM((batch_tile, Hp), jnp.float32),  # c state
        ],
    )

    out_p = pl.pallas_call(
        partial(_lstm_kernel, mxu_dtype=mxu_dtype, seq_len=T,
                time_chunk=time_chunk, has_tail=has_tail, unroll=unroll),
        out_shape=jax.ShapeDtypeStruct((Bp, Op), jnp.float32),
        grid_spec=grid_spec,
        compiler_params=pltpu.CompilerParams(
            dimension_semantics=("parallel", "arbitrary"),  # batch parallel, time sequential
            vmem_limit_bytes=vmem_limit,
        ),
    )(xw, w_hh_p.astype(mxu_dtype), w_fc_p.astype(mxu_dtype), b_fc_p)

    return out_p[:B, :O]


def lstm_reference(x_btd, w_ih, w_hh, b_ih, b_hh, w_fc, b_fc):
    """Pure-JAX reference mirroring torch.nn.LSTM (1 layer, batch_first) + Linear."""
    B, T, I = x_btd.shape
    H = w_hh.shape[0]
    P = jax.lax.Precision.HIGHEST
    h = jnp.zeros((B, H), jnp.float32)
    c = jnp.zeros((B, H), jnp.float32)
    b = (b_ih + b_hh)[None, :]
    for t in range(T):
        gates = (jnp.dot(x_btd[:, t, :], w_ih, precision=P)
                 + jnp.dot(h, w_hh, precision=P) + b)
        i_g = _sigmoid_ref(gates[:, 0 * H:1 * H])
        f_g = _sigmoid_ref(gates[:, 1 * H:2 * H])
        g_g = jnp.tanh(gates[:, 2 * H:3 * H])
        o_g = _sigmoid_ref(gates[:, 3 * H:4 * H])
        c = f_g * c + i_g * g_g
        h = o_g * jnp.tanh(c)
    return jnp.dot(h, w_fc, precision=P) + b_fc[None, :]


if __name__ == "__main__":
    # Small shapes consistent with the module: batch=2, seq=8, input=16, hidden=32, output=8
    B, T, I, H, O = 2, 8, 16, 32, 8

    key = jax.random.PRNGKey(0)
    ks = jax.random.split(key, 7)
    bound = 1.0 / np.sqrt(H)  # PyTorch default LSTM/Linear init scale

    # Weights stored already transposed for `x @ W` (PyTorch stores [4H, I] etc.)
    w_ih = jax.random.uniform(ks[0], (I, 4 * H), jnp.float32, -bound, bound)
    w_hh = jax.random.uniform(ks[1], (H, 4 * H), jnp.float32, -bound, bound)
    b_ih = jax.random.uniform(ks[2], (4 * H,), jnp.float32, -bound, bound)
    b_hh = jax.random.uniform(ks[3], (4 * H,), jnp.float32, -bound, bound)
    w_fc = jax.random.uniform(ks[4], (H, O), jnp.float32, -bound, bound)
    b_fc = jax.random.uniform(ks[5], (O,), jnp.float32, -bound, bound)

    x = jax.random.normal(ks[6], (B, T, I), jnp.float32)  # batch_first, like PyTorch

    ref = lstm_reference(x, w_ih, w_hh, b_ih, b_hh, w_fc, b_fc)

    # f32 MXU path: strict check against the reference.
    out = lstm_forward(x, w_ih, w_hh, b_ih, b_hh, w_fc, b_fc, mxu_dtype=jnp.float32)
    out = jax.block_until_ready(out)
    np.testing.assert_allclose(np.asarray(out), np.asarray(ref), atol=3e-4, rtol=3e-4)

    # Non-divisor time chunk: exercises the cdiv grid + masked-tail path.
    out_tail = lstm_forward(x, w_ih, w_hh, b_ih, b_hh, w_fc, b_fc,
                            mxu_dtype=jnp.float32, time_chunk=3)
    out_tail = jax.block_until_ready(out_tail)
    np.testing.assert_allclose(np.asarray(out_tail), np.asarray(ref), atol=3e-4, rtol=3e-4)

    # bf16 MXU path (the recommended mode at realistic H): needs native bf16 dot support,
    # so only exercised when actually running on TPU hardware.
    if jax.default_backend() == "tpu":
        out_bf16 = lstm_forward(x, w_ih, w_hh, b_ih, b_hh, w_fc, b_fc,
                                mxu_dtype=jnp.bfloat16)
        out_bf16 = jax.block_until_ready(out_bf16)
        np.testing.assert_allclose(np.asarray(out_bf16), np.asarray(ref), atol=1e-1, rtol=0)

    print("KERNEL_OK")
</pallas_src>

<mosaic_0001>
module attributes {stable_mosaic.version = 11 : i64} {
  func.func @_lstm_kernel(%arg0: i32, %arg1: i32, %arg2: memref<8x8x512xf32, #tpu.memory_space<vmem>>, %arg3: memref<128x512xf32, #tpu.memory_space<vmem>>, %arg4: memref<128x128xf32, #tpu.memory_space<vmem>>, %arg5: memref<1x128xf32, #tpu.memory_space<vmem>>, %arg6: memref<8x128xf32, #tpu.memory_space<vmem>>, %arg7: memref<8x128xf32, #tpu.memory_space<vmem>>, %arg8: memref<8x128xf32, #tpu.memory_space<vmem>>) attributes {dimension_semantics = [#tpu.dimension_semantics<parallel>, #tpu.dimension_semantics<arbitrary>], iteration_bounds = array<i64: 1, 1>, scalar_prefetch = 0 : i64, scratch_operands = 2 : i64, tpu.core_type = #tpu.core_type<tc>, window_params = [{transform_indices = @transform_0, window_bounds = array<i64: 8, 8, 512>}, {pipeline_mode = #tpu.pipeline_mode<synchronous>, transform_indices = @transform_1, window_bounds = array<i64: 128, 512>}, {pipeline_mode = #tpu.pipeline_mode<synchronous>, transform_indices = @transform_2, window_bounds = array<i64: 128, 128>}, {pipeline_mode = #tpu.pipeline_mode<synchronous>, transform_indices = @transform_3, window_bounds = array<i64: 1, 128>}, {transform_indices = @transform_4, window_bounds = array<i64: 8, 128>}]} {
    %c0_i32 = arith.constant 0 : i32
    %0 = arith.cmpi eq, %arg1, %c0_i32 : i32
    %1 = arith.extui %0 : i1 to i32
    %c0_i32_0 = arith.constant 0 : i32
    %2 = arith.cmpi ne, %1, %c0_i32_0 : i32
    scf.if %2 {
      %cst_108 = arith.constant 0.000000e+00 : f32
      %299 = vector.broadcast %cst_108 : f32 to vector<8x128xf32>
      %c0_109 = arith.constant 0 : index
      %c0_110 = arith.constant 0 : index
      %300 = vector.load %arg7[%c0_109, %c0_110] : memref<8x128xf32, #tpu.memory_space<vmem>>, vector<8x128xf32>
      tpu.vector_store %arg7[%c0_109, %c0_110], %299 {strides = array<i32>} : memref<8x128xf32, #tpu.memory_space<vmem>>, vector<8x128xf32>,
      %cst_111 = arith.constant 0.000000e+00 : f32
      %301 = vector.broadcast %cst_111 : f32 to vector<8x128xf32>
      %c0_112 = arith.constant 0 : index
      %c0_113 = arith.constant 0 : index
      %302 = vector.load %arg8[%c0_112, %c0_113] : memref<8x128xf32, #tpu.memory_space<vmem>>, vector<8x128xf32>
      tpu.vector_store %arg8[%c0_112, %c0_113], %301 {strides = array<i32>} : memref<8x128xf32, #tpu.memory_space<vmem>>, vector<8x128xf32>,
    } else {
    }
    %c0 = arith.constant 0 : index
    %c0_1 = arith.constant 0 : index
    %3 = vector.load %arg3[%c0, %c0_1] : memref<128x512xf32, #tpu.memory_space<vmem>>, vector<128x512xf32>
    %c0_2 = arith.constant 0 : index
    %c0_3 = arith.constant 0 : index
    %4 = vector.load %arg7[%c0_2, %c0_3] : memref<8x128xf32, #tpu.memory_space<vmem>>, vector<8x128xf32>
    %c0_4 = arith.constant 0 : index
    %c0_5 = arith.constant 0 : index
    %5 = vector.load %arg8[%c0_4, %c0_5] : memref<8x128xf32, #tpu.memory_space<vmem>>, vector<8x128xf32>
    %c0_i32_6 = arith.constant 0 : i32
    %6 = arith.index_cast %c0_i32_6 : i32 to index
    %c0_7 = arith.constant 0 : index
    %c0_8 = arith.constant 0 : index
    %7 = vector.load %arg2[%6, %c0_7, %c0_8] : memref<8x8x512xf32, #tpu.memory_space<vmem>>, vector<1x8x512xf32>
    %8 = vector.shape_cast %7 : vector<1x8x512xf32> to vector<8x512xf32>
    %cst = arith.constant dense<0.000000e+00> : vector<8x512xf32>
    %9 = tpu.matmul %4, %3, %cst {dimension_numbers = #tpu.dot_dimension_numbers<[1], [0], [0], [1], [0, 0, 1, 1], [], []>} : vector<8x128xf32>, vector<128x512xf32>, vector<8x512xf32> -> vector<8x512xf32>
    %10 = arith.addf %8, %9 : vector<8x512xf32>
    %11 = vector.extract_strided_slice %10 {offsets = [0, 0], sizes = [8, 128], strides = [1, 1]} : vector<8x512xf32> to vector<8x128xf32>
    %cst_9 = arith.constant 5.000000e-01 : f32
    %12 = vector.broadcast %cst_9 : f32 to vector<8x128xf32>
    %13 = arith.mulf %12, %11 : vector<8x128xf32>
    %14 = math.tanh %13 : vector<8x128xf32>
    %cst_10 = arith.constant 1.000000e+00 : f32
    %15 = vector.broadcast %cst_10 : f32 to vector<8x128xf32>
    %16 = arith.addf %15, %14 : vector<8x128xf32>
    %cst_11 = arith.constant 5.000000e-01 : f32
    %17 = vector.broadcast %cst_11 : f32 to vector<8x128xf32>
    %18 = arith.mulf %17, %16 : vector<8x128xf32>
    %19 = vector.extract_strided_slice %10 {offsets = [0, 128], sizes = [8, 128], strides = [1, 1]} : vector<8x512xf32> to vector<8x128xf32>
    %cst_12 = arith.constant 5.000000e-01 : f32
    %20 = vector.broadcast %cst_12 : f32 to vector<8x128xf32>
    %21 = arith.mulf %20, %19 : vector<8x128xf32>
    %22 = math.tanh %21 : vector<8x128xf32>
    %cst_13 = arith.constant 1.000000e+00 : f32
    %23 = vector.broadcast %cst_13 : f32 to vector<8x128xf32>
    %24 = arith.addf %23, %22 : vector<8x128xf32>
    %cst_14 = arith.constant 5.000000e-01 : f32
    %25 = vector.broadcast %cst_14 : f32 to vector<8x128xf32>
    %26 = arith.mulf %25, %24 : vector<8x128xf32>
    %27 = vector.extract_strided_slice %10 {offsets = [0, 256], sizes = [8, 128], strides = [1, 1]} : vector<8x512xf32> to vector<8x128xf32>
    %28 = math.tanh %27 : vector<8x128xf32>
    %29 = vector.extract_strided_slice %10 {offsets = [0, 384], sizes = [8, 128], strides = [1, 1]} : vector<8x512xf32> to vector<8x128xf32>
    %cst_15 = arith.constant 5.000000e-01 : f32
    %30 = vector.broadcast %cst_15 : f32 to vector<8x128xf32>
    %31 = arith.mulf %30, %29 : vector<8x128xf32>
    %32 = math.tanh %31 : vector<8x128xf32>
    %cst_16 = arith.constant 1.000000e+00 : f32
    %33 = vector.broadcast %cst_16 : f32 to vector<8x128xf32>
    %34 = arith.addf %33, %32 : vector<8x128xf32>
    %cst_17 = arith.constant 5.000000e-01 : f32
    %35 = vector.broadcast %cst_17 : f32 to vector<8x128xf32>
    %36 = arith.mulf %35, %34 : vector<8x128xf32>
    %37 = arith.mulf %26, %5 : vector<8x128xf32>
    %38 = arith.mulf %18, %28 : vector<8x128xf32>
    %39 = arith.addf %37, %38 : vector<8x128xf32>
    %40 = math.tanh %39 : vector<8x128xf32>
    %41 = arith.mulf %36, %40 : vector<8x128xf32>
    %c1_i32 = arith.constant 1 : i32
    %42 = arith.index_cast %c1_i32 : i32 to index
    %c0_18 = arith.constant 0 : index
    %c0_19 = arith.constant 0 : index
    %43 = vector.load %arg2[%42, %c0_18, %c0_19] : memref<8x8x512xf32, #tpu.memory_space<vmem>>, vector<1x8x512xf32>
    %44 = vector.shape_cast %43 : vector<1x8x512xf32> to vector<8x512xf32>
    %cst_20 = arith.constant dense<0.000000e+00> : vector<8x512xf32>
    %45 = tpu.matmul %41, %3, %cst_20 {dimension_numbers = #tpu.dot_dimension_numbers<[1], [0], [0], [1], [0, 0, 1, 1], [], []>} : vector<8x128xf32>, vector<128x512xf32>, vector<8x512xf32> -> vector<8x512xf32>
    %46 = arith.addf %44, %45 : vector<8x512xf32>
    %47 = vector.extract_strided_slice %46 {offsets = [0, 0], sizes = [8, 128], strides = [1, 1]} : vector<8x512xf32> to vector<8x128xf32>
    %cst_21 = arith.constant 5.000000e-01 : f32
    %48 = vector.broadcast %cst_21 : f32 to vector<8x128xf32>
    %49 = arith.mulf %48, %47 : vector<8x128xf32>
    %50 = math.tanh %49 : vector<8x128xf32>
    %cst_22 = arith.constant 1.000000e+00 : f32
    %51 = vector.broadcast %cst_22 : f32 to vector<8x128xf32>
    %52 = arith.addf %51, %50 : vector<8x128xf32>
    %cst_23 = arith.constant 5.000000e-01 : f32
    %53 = vector.broadcast %cst_23 : f32 to vector<8x128xf32>
    %54 = arith.mulf %53, %52 : vector<8x128xf32>
    %55 = vector.extract_strided_slice %46 {offsets = [0, 128], sizes = [8, 128], strides = [1, 1]} : vector<8x512xf32> to vector<8x128xf32>
    %cst_24 = arith.constant 5.000000e-01 : f32
    %56 = vector.broadcast %cst_24 : f32 to vector<8x128xf32>
    %57 = arith.mulf %56, %55 : vector<8x128xf32>
    %58 = math.tanh %57 : vector<8x128xf32>
    %cst_25 = arith.constant 1.000000e+00 : f32
    %59 = vector.broadcast %cst_25 : f32 to vector<8x128xf32>
    %60 = arith.addf %59, %58 : vector<8x128xf32>
    %cst_26 = arith.constant 5.000000e-01 : f32
    %61 = vector.broadcast %cst_26 : f32 to vector<8x128xf32>
    %62 = arith.mulf %61, %60 : vector<8x128xf32>
    %63 = vector.extract_strided_slice %46 {offsets = [0, 256], sizes = [8, 128], strides = [1, 1]} : vector<8x512xf32> to vector<8x128xf32>
    %64 = math.tanh %63 : vector<8x128xf32>
    %65 = vector.extract_strided_slice %46 {offsets = [0, 384], sizes = [8, 128], strides = [1, 1]} : vector<8x512xf32> to vector<8x128xf32>
    %cst_27 = arith.constant 5.000000e-01 : f32
    %66 = vector.broadcast %cst_27 : f32 to vector<8x128xf32>
    %67 = arith.mulf %66, %65 : vector<8x128xf32>
    %68 = math.tanh %67 : vector<8x128xf32>
    %cst_28 = arith.constant 1.000000e+00 : f32
    %69 = vector.broadcast %cst_28 : f32 to vector<8x128xf32>
    %70 = arith.addf %69, %68 : vector<8x128xf32>
    %cst_29 = arith.constant 5.000000e-01 : f32
    %71 = vector.broadcast %cst_29 : f32 to vector<8x128xf32>
    %72 = arith.mulf %71, %70 : vector<8x128xf32>
    %73 = arith.mulf %62, %39 : vector<8x128xf32>
    %74 = arith.mulf %54, %64 : vector<8x128xf32>
    %75 = arith.addf %73, %74 : vector<8x128xf32>
    %76 = math.tanh %75 : vector<8x128xf32>
    %77 = arith.mulf %72, %76 : vector<8x128xf32>
    %c2_i32 = arith.constant 2 : i32
    %78 = arith.index_cast %c2_i32 : i32 to index
    %c0_30 = arith.constant 0 : index
    %c0_31 = arith.constant 0 : index
    %79 = vector.load %arg2[%78, %c0_30, %c0_31] : memref<8x8x512xf32, #tpu.memory_space<vmem>>, vector<1x8x512xf32>
    %80 = vector.shape_cast %79 : vector<1x8x512xf32> to vector<8x512xf32>
    %cst_32 = arith.constant dense<0.000000e+00> : vector<8x512xf32>
    %81 = tpu.matmul %77, %3, %cst_32 {dimension_numbers = #tpu.dot_dimension_numbers<[1], [0], [0], [1], [0, 0, 1, 1], [], []>} : vector<8x128xf32>, vector<128x512xf32>, vector<8x512xf32> -> vector<8x512xf32>
    %82 = arith.addf %80, %81 : vector<8x512xf32>
    %83 = vector.extract_strided_slice %82 {offsets = [0, 0], sizes = [8, 128], strides = [1, 1]} : vector<8x512xf32> to vector<8x128xf32>
    %cst_33 = arith.constant 5.000000e-01 : f32
    %84 = vector.broadcast %cst_33 : f32 to vector<8x128xf32>
    %85 = arith.mulf %84, %83 : vector<8x128xf32>
    %86 = math.tanh %85 : vector<8x128xf32>
    %cst_34 = arith.constant 1.000000e+00 : f32
    %87 = vector.broadcast %cst_34 : f32 to vector<8x128xf32>
    %88 = arith.addf %87, %86 : vector<8x128xf32>
    %cst_35 = arith.constant 5.000000e-01 : f32
    %89 = vector.broadcast %cst_35 : f32 to vector<8x128xf32>
    %90 = arith.mulf %89, %88 : vector<8x128xf32>
    %91 = vector.extract_strided_slice %82 {offsets = [0, 128], sizes = [8, 128], strides = [1, 1]} : vector<8x512xf32> to vector<8x128xf32>
    %cst_36 = arith.constant 5.000000e-01 : f32
    %92 = vector.broadcast %cst_36 : f32 to vector<8x128xf32>
    %93 = arith.mulf %92, %91 : vector<8x128xf32>
    %94 = math.tanh %93 : vector<8x128xf32>
    %cst_37 = arith.constant 1.000000e+00 : f32
    %95 = vector.broadcast %cst_37 : f32 to vector<8x128xf32>
    %96 = arith.addf %95, %94 : vector<8x128xf32>
    %cst_38 = arith.constant 5.000000e-01 : f32
    %97 = vector.broadcast %cst_38 : f32 to vector<8x128xf32>
    %98 = arith.mulf %97, %96 : vector<8x128xf32>
    %99 = vector.extract_strided_slice %82 {offsets = [0, 256], sizes = [8, 128], strides = [1, 1]} : vector<8x512xf32> to vector<8x128xf32>
    %100 = math.tanh %99 : vector<8x128xf32>
    %101 = vector.extract_strided_slice %82 {offsets = [0, 384], sizes = [8, 128], strides = [1, 1]} : vector<8x512xf32> to vector<8x128xf32>
    %cst_39 = arith.constant 5.000000e-01 : f32
    %102 = vector.broadcast %cst_39 : f32 to vector<8x128xf32>
    %103 = arith.mulf %102, %101 : vector<8x128xf32>
    %104 = math.tanh %103 : vector<8x128xf32>
    %cst_40 = arith.constant 1.000000e+00 : f32
    %105 = vector.broadcast %cst_40 : f32 to vector<8x128xf32>
    %106 = arith.addf %105, %104 : vector<8x128xf32>
    %cst_41 = arith.constant 5.000000e-01 : f32
    %107 = vector.broadcast %cst_41 : f32 to vector<8x128xf32>
    %108 = arith.mulf %107, %106 : vector<8x128xf32>
    %109 = arith.mulf %98, %75 : vector<8x128xf32>
    %110 = arith.mulf %90, %100 : vector<8x128xf32>
    %111 = arith.addf %109, %110 : vector<8x128xf32>
    %112 = math.tanh %111 : vector<8x128xf32>
    %113 = arith.mulf %108, %112 : vector<8x128xf32>
    %c3_i32 = arith.constant 3 : i32
    %114 = arith.index_cast %c3_i32 : i32 to index
    %c0_42 = arith.constant 0 : index
    %c0_43 = arith.constant 0 : index
    %115 = vector.load %arg2[%114, %c0_42, %c0_43] : memref<8x8x512xf32, #tpu.memory_space<vmem>>, vector<1x8x512xf32>
    %116 = vector.shape_cast %115 : vector<1x8x512xf32> to vector<8x512xf32>
    %cst_44 = arith.constant dense<0.000000e+00> : vector<8x512xf32>
    %117 = tpu.matmul %113, %3, %cst_44 {dimension_numbers = #tpu.dot_dimension_numbers<[1], [0], [0], [1], [0, 0, 1, 1], [], []>} : vector<8x128xf32>, vector<128x512xf32>, vector<8x512xf32> -> vector<8x512xf32>
    %118 = arith.addf %116, %117 : vector<8x512xf32>
    %119 = vector.extract_strided_slice %118 {offsets = [0, 0], sizes = [8, 128], strides = [1, 1]} : vector<8x512xf32> to vector<8x128xf32>
    %cst_45 = arith.constant 5.000000e-01 : f32
    %120 = vector.broadcast %cst_45 : f32 to vector<8x128xf32>
    %121 = arith.mulf %120, %119 : vector<8x128xf32>
    %122 = math.tanh %121 : vector<8x128xf32>
    %cst_46 = arith.constant 1.000000e+00 : f32
    %123 = vector.broadcast %cst_46 : f32 to vector<8x128xf32>
    %124 = arith.addf %123, %122 : vector<8x128xf32>
    %cst_47 = arith.constant 5.000000e-01 : f32
    %125 = vector.broadcast %cst_47 : f32 to vector<8x128xf32>
    %126 = arith.mulf %125, %124 : vector<8x128xf32>
    %127 = vector.extract_strided_slice %118 {offsets = [0, 128], sizes = [8, 128], strides = [1, 1]} : vector<8x512xf32> to vector<8x128xf32>
    %cst_48 = arith.constant 5.000000e-01 : f32
    %128 = vector.broadcast %cst_48 : f32 to vector<8x128xf32>
    %129 = arith.mulf %128, %127 : vector<8x128xf32>
    %130 = math.tanh %129 : vector<8x128xf32>
    %cst_49 = arith.constant 1.000000e+00 : f32
    %131 = vector.broadcast %cst_49 : f32 to vector<8x128xf32>
    %132 = arith.addf %131, %130 : vector<8x128xf32>
    %cst_50 = arith.constant 5.000000e-01 : f32
    %133 = vector.broadcast %cst_50 : f32 to vector<8x128xf32>
    %134 = arith.mulf %133, %132 : vector<8x128xf32>
    %135 = vector.extract_strided_slice %118 {offsets = [0, 256], sizes = [8, 128], strides = [1, 1]} : vector<8x512xf32> to vector<8x128xf32>
    %136 = math.tanh %135 : vector<8x128xf32>
    %137 = vector.extract_strided_slice %118 {offsets = [0, 384], sizes = [8, 128], strides = [1, 1]} : vector<8x512xf32> to vector<8x128xf32>
    %cst_51 = arith.constant 5.000000e-01 : f32
    %138 = vector.broadcast %cst_51 : f32 to vector<8x128xf32>
    %139 = arith.mulf %138, %137 : vector<8x128xf32>
    %140 = math.tanh %139 : vector<8x128xf32>
    %cst_52 = arith.constant 1.000000e+00 : f32
    %141 = vector.broadcast %cst_52 : f32 to vector<8x128xf32>
    %142 = arith.addf %141, %140 : vector<8x128xf32>
    %cst_53 = arith.constant 5.000000e-01 : f32
    %143 = vector.broadcast %cst_53 : f32 to vector<8x128xf32>
    %144 = arith.mulf %143, %142 : vector<8x128xf32>
    %145 = arith.mulf %134, %111 : vector<8x128xf32>
    %146 = arith.mulf %126, %136 : vector<8x128xf32>
    %147 = arith.addf %145, %146 : vector<8x128xf32>
    %148 = math.tanh %147 : vector<8x128xf32>
    %149 = arith.mulf %144, %148 : vector<8x128xf32>
    %c4_i32 = arith.constant 4 : i32
    %150 = arith.index_cast %c4_i32 : i32 to index
    %c0_54 = arith.constant 0 : index
    %c0_55 = arith.constant 0 : index
    %151 = vector.load %arg2[%150, %c0_54, %c0_55] : memref<8x8x512xf32, #tpu.memory_space<vmem>>, vector<1x8x512xf32>
    %152 = vector.shape_cast %151 : vector<1x8x512xf32> to vector<8x512xf32>
    %cst_56 = arith.constant dense<0.000000e+00> : vector<8x512xf32>
    %153 = tpu.matmul %149, %3, %cst_56 {dimension_numbers = #tpu.dot_dimension_numbers<[1], [0], [0], [1], [0, 0, 1, 1], [], []>} : vector<8x128xf32>, vector<128x512xf32>, vector<8x512xf32> -> vector<8x512xf32>
    %154 = arith.addf %152, %153 : vector<8x512xf32>
    %155 = vector.extract_strided_slice %154 {offsets = [0, 0], sizes = [8, 128], strides = [1, 1]} : vector<8x512xf32> to vector<8x128xf32>
    %cst_57 = arith.constant 5.000000e-01 : f32
    %156 = vector.broadcast %cst_57 : f32 to vector<8x128xf32>
    %157 = arith.mulf %156, %155 : vector<8x128xf32>
    %158 = math.tanh %157 : vector<8x128xf32>
    %cst_58 = arith.constant 1.000000e+00 : f32
    %159 = vector.broadcast %cst_58 : f32 to vector<8x128xf32>
    %160 = arith.addf %159, %158 : vector<8x128xf32>
    %cst_59 = arith.constant 5.000000e-01 : f32
    %161 = vector.broadcast %cst_59 : f32 to vector<8x128xf32>
    %162 = arith.mulf %161, %160 : vector<8x128xf32>
    %163 = vector.extract_strided_slice %154 {offsets = [0, 128], sizes = [8, 128], strides = [1, 1]} : vector<8x512xf32> to vector<8x128xf32>
    %cst_60 = arith.constant 5.000000e-01 : f32
    %164 = vector.broadcast %cst_60 : f32 to vector<8x128xf32>
    %165 = arith.mulf %164, %163 : vector<8x128xf32>
    %166 = math.tanh %165 : vector<8x128xf32>
    %cst_61 = arith.constant 1.000000e+00 : f32
    %167 = vector.broadcast %cst_61 : f32 to vector<8x128xf32>
    %168 = arith.addf %167, %166 : vector<8x128xf32>
    %cst_62 = arith.constant 5.000000e-01 : f32
    %169 = vector.broadcast %cst_62 : f32 to vector<8x128xf32>
    %170 = arith.mulf %169, %168 : vector<8x128xf32>
    %171 = vector.extract_strided_slice %154 {offsets = [0, 256], sizes = [8, 128], strides = [1, 1]} : vector<8x512xf32> to vector<8x128xf32>
    %172 = math.tanh %171 : vector<8x128xf32>
    %173 = vector.extract_strided_slice %154 {offsets = [0, 384], sizes = [8, 128], strides = [1, 1]} : vector<8x512xf32> to vector<8x128xf32>
    %cst_63 = arith.constant 5.000000e-01 : f32
    %174 = vector.broadcast %cst_63 : f32 to vector<8x128xf32>
    %175 = arith.mulf %174, %173 : vector<8x128xf32>
    %176 = math.tanh %175 : vector<8x128xf32>
    %cst_64 = arith.constant 1.000000e+00 : f32
    %177 = vector.broadcast %cst_64 : f32 to vector<8x128xf32>
    %178 = arith.addf %177, %176 : vector<8x128xf32>
    %cst_65 = arith.constant 5.000000e-01 : f32
    %179 = vector.broadcast %cst_65 : f32 to vector<8x128xf32>
    %180 = arith.mulf %179, %178 : vector<8x128xf32>
    %181 = arith.mulf %170, %147 : vector<8x128xf32>
    %182 = arith.mulf %162, %172 : vector<8x128xf32>
    %183 = arith.addf %181, %182 : vector<8x128xf32>
    %184 = math.tanh %183 : vector<8x128xf32>
    %185 = arith.mulf %180, %184 : vector<8x128xf32>
    %c5_i32 = arith.constant 5 : i32
    %186 = arith.index_cast %c5_i32 : i32 to index
    %c0_66 = arith.constant 0 : index
    %c0_67 = arith.constant 0 : index
    %187 = vector.load %arg2[%186, %c0_66, %c0_67] : memref<8x8x512xf32, #tpu.memory_space<vmem>>, vector<1x8x512xf32>
    %188 = vector.shape_cast %187 : vector<1x8x512xf32> to vector<8x512xf32>
    %cst_68 = arith.constant dense<0.000000e+00> : vector<8x512xf32>
    %189 = tpu.matmul %185, %3, %cst_68 {dimension_numbers = #tpu.dot_dimension_numbers<[1], [0], [0], [1], [0, 0, 1, 1], [], []>} : vector<8x128xf32>, vector<128x512xf32>, vector<8x512xf32> -> vector<8x512xf32>
    %190 = arith.addf %188, %189 : vector<8x512xf32>
    %191 = vector.extract_strided_slice %190 {offsets = [0, 0], sizes = [8, 128], strides = [1, 1]} : vector<8x512xf32> to vector<8x128xf32>
    %cst_69 = arith.constant 5.000000e-01 : f32
    %192 = vector.broadcast %cst_69 : f32 to vector<8x128xf32>
    %193 = arith.mulf %192, %191 : vector<8x128xf32>
    %194 = math.tanh %193 : vector<8x128xf32>
    %cst_70 = arith.constant 1.000000e+00 : f32
    %195 = vector.broadcast %cst_70 : f32 to vector<8x128xf32>
    %196 = arith.addf %195, %194 : vector<8x128xf32>
    %cst_71 = arith.constant 5.000000e-01 : f32
    %197 = vector.broadcast %cst_71 : f32 to vector<8x128xf32>
    %198 = arith.mulf %197, %196 : vector<8x128xf32>
    %199 = vector.extract_strided_slice %190 {offsets = [0, 128], sizes = [8, 128], strides = [1, 1]} : vector<8x512xf32> to vector<8x128xf32>
    %cst_72 = arith.constant 5.000000e-01 : f32
    %200 = vector.broadcast %cst_72 : f32 to vector<8x128xf32>
    %201 = arith.mulf %200, %199 : vector<8x128xf32>
    %202 = math.tanh %201 : vector<8x128xf32>
    %cst_73 = arith.constant 1.000000e+00 : f32
    %203 = vector.broadcast %cst_73 : f32 to vector<8x128xf32>
    %204 = arith.addf %203, %202 : vector<8x128xf32>
    %cst_74 = arith.constant 5.000000e-01 : f32
    %205 = vector.broadcast %cst_74 : f32 to vector<8x128xf32>
    %206 = arith.mulf %205, %204 : vector<8x128xf32>
    %207 = vector.extract_strided_slice %190 {offsets = [0, 256], sizes = [8, 128], strides = [1, 1]} : vector<8x512xf32> to vector<8x128xf32>
    %208 = math.tanh %207 : vector<8x128xf32>
    %209 = vector.extract_strided_slice %190 {offsets = [0, 384], sizes = [8, 128], strides = [1, 1]} : vector<8x512xf32> to vector<8x128xf32>
    %cst_75 = arith.constant 5.000000e-01 : f32
    %210 = vector.broadcast %cst_75 : f32 to vector<8x128xf32>
    %211 = arith.mulf %210, %209 : vector<8x128xf32>
    %212 = math.tanh %211 : vector<8x128xf32>
    %cst_76 = arith.constant 1.000000e+00 : f32
    %213 = vector.broadcast %cst_76 : f32 to vector<8x128xf32>
    %214 = arith.addf %213, %212 : vector<8x128xf32>
    %cst_77 = arith.constant 5.000000e-01 : f32
    %215 = vector.broadcast %cst_77 : f32 to vector<8x128xf32>
    %216 = arith.mulf %215, %214 : vector<8x128xf32>
    %217 = arith.mulf %206, %183 : vector<8x128xf32>
    %218 = arith.mulf %198, %208 : vector<8x128xf32>
    %219 = arith.addf %217, %218 : vector<8x128xf32>
    %220 = math.tanh %219 : vector<8x128xf32>
    %221 = arith.mulf %216, %220 : vector<8x128xf32>
    %c6_i32 = arith.constant 6 : i32
    %222 = arith.index_cast %c6_i32 : i32 to index
    %c0_78 = arith.constant 0 : index
    %c0_79 = arith.constant 0 : index
    %223 = vector.load %arg2[%222, %c0_78, %c0_79] : memref<8x8x512xf32, #tpu.memory_space<vmem>>, vector<1x8x512xf32>
    %224 = vector.shape_cast %223 : vector<1x8x512xf32> to vector<8x512xf32>
    %cst_80 = arith.constant dense<0.000000e+00> : vector<8x512xf32>
    %225 = tpu.matmul %221, %3, %cst_80 {dimension_numbers = #tpu.dot_dimension_numbers<[1], [0], [0], [1], [0, 0, 1, 1], [], []>} : vector<8x128xf32>, vector<128x512xf32>, vector<8x512xf32> -> vector<8x512xf32>
    %226 = arith.addf %224, %225 : vector<8x512xf32>
    %227 = vector.extract_strided_slice %226 {offsets = [0, 0], sizes = [8, 128], strides = [1, 1]} : vector<8x512xf32> to vector<8x128xf32>
    %cst_81 = arith.constant 5.000000e-01 : f32
    %228 = vector.broadcast %cst_81 : f32 to vector<8x128xf32>
    %229 = arith.mulf %228, %227 : vector<8x128xf32>
    %230 = math.tanh %229 : vector<8x128xf32>
    %cst_82 = arith.constant 1.000000e+00 : f32
    %231 = vector.broadcast %cst_82 : f32 to vector<8x128xf32>
    %232 = arith.addf %231, %230 : vector<8x128xf32>
    %cst_83 = arith.constant 5.000000e-01 : f32
    %233 = vector.broadcast %cst_83 : f32 to vector<8x128xf32>
    %234 = arith.mulf %233, %232 : vector<8x128xf32>
    %235 = vector.extract_strided_slice %226 {offsets = [0, 128], sizes = [8, 128], strides = [1, 1]} : vector<8x512xf32> to vector<8x128xf32>
    %cst_84 = arith.constant 5.000000e-01 : f32
    %236 = vector.broadcast %cst_84 : f32 to vector<8x128xf32>
    %237 = arith.mulf %236, %235 : vector<8x128xf32>
    %238 = math.tanh %237 : vector<8x128xf32>
    %cst_85 = arith.constant 1.000000e+00 : f32
    %239 = vector.broadcast %cst_85 : f32 to vector<8x128xf32>
    %240 = arith.addf %239, %238 : vector<8x128xf32>
    %cst_86 = arith.constant 5.000000e-01 : f32
    %241 = vector.broadcast %cst_86 : f32 to vector<8x128xf32>
    %242 = arith.mulf %241, %240 : vector<8x128xf32>
    %243 = vector.extract_strided_slice %226 {offsets = [0, 256], sizes = [8, 128], strides = [1, 1]} : vector<8x512xf32> to vector<8x128xf32>
    %244 = math.tanh %243 : vector<8x128xf32>
    %245 = vector.extract_strided_slice %226 {offsets = [0, 384], sizes = [8, 128], strides = [1, 1]} : vector<8x512xf32> to vector<8x128xf32>
    %cst_87 = arith.constant 5.000000e-01 : f32
    %246 = vector.broadcast %cst_87 : f32 to vector<8x128xf32>
    %247 = arith.mulf %246, %245 : vector<8x128xf32>
    %248 = math.tanh %247 : vector<8x128xf32>
    %cst_88 = arith.constant 1.000000e+00 : f32
    %249 = vector.broadcast %cst_88 : f32 to vector<8x128xf32>
    %250 = arith.addf %249, %248 : vector<8x128xf32>
    %cst_89 = arith.constant 5.000000e-01 : f32
    %251 = vector.broadcast %cst_89 : f32 to vector<8x128xf32>
    %252 = arith.mulf %251, %250 : vector<8x128xf32>
    %253 = arith.mulf %242, %219 : vector<8x128xf32>
    %254 = arith.mulf %234, %244 : vector<8x128xf32>
    %255 = arith.addf %253, %254 : vector<8x128xf32>
    %256 = math.tanh %255 : vector<8x128xf32>
    %257 = arith.mulf %252, %256 : vector<8x128xf32>
    %c7_i32 = arith.constant 7 : i32
    %258 = arith.index_cast %c7_i32 : i32 to index
    %c0_90 = arith.constant 0 : index
    %c0_91 = arith.constant 0 : index
    %259 = vector.load %arg2[%258, %c0_90, %c0_91] : memref<8x8x512xf32, #tpu.memory_space<vmem>>, vector<1x8x512xf32>
    %260 = vector.shape_cast %259 : vector<1x8x512xf32> to vector<8x512xf32>
    %cst_92 = arith.constant dense<0.000000e+00> : vector<8x512xf32>
    %261 = tpu.matmul %257, %3, %cst_92 {dimension_numbers = #tpu.dot_dimension_numbers<[1], [0], [0], [1], [0, 0, 1, 1], [], []>} : vector<8x128xf32>, vector<128x512xf32>, vector<8x512xf32> -> vector<8x512xf32>
    %262 = arith.addf %260, %261 : vector<8x512xf32>
    %263 = vector.extract_strided_slice %262 {offsets = [0, 0], sizes = [8, 128], strides = [1, 1]} : vector<8x512xf32> to vector<8x128xf32>
    %cst_93 = arith.constant 5.000000e-01 : f32
    %264 = vector.broadcast %cst_93 : f32 to vector<8x128xf32>
    %265 = arith.mulf %264, %263 : vector<8x128xf32>
    %266 = math.tanh %265 : vector<8x128xf32>
    %cst_94 = arith.constant 1.000000e+00 : f32
    %267 = vector.broadcast %cst_94 : f32 to vector<8x128xf32>
    %268 = arith.addf %267, %266 : vector<8x128xf32>
    %cst_95 = arith.constant 5.000000e-01 : f32
    %269 = vector.broadcast %cst_95 : f32 to vector<8x128xf32>
    %270 = arith.mulf %269, %268 : vector<8x128xf32>
    %271 = vector.extract_strided_slice %262 {offsets = [0, 128], sizes = [8, 128], strides = [1, 1]} : vector<8x512xf32> to vector<8x128xf32>
    %cst_96 = arith.constant 5.000000e-01 : f32
    %272 = vector.broadcast %cst_96 : f32 to vector<8x128xf32>
    %273 = arith.mulf %272, %271 : vector<8x128xf32>
    %274 = math.tanh %273 : vector<8x128xf32>
    %cst_97 = arith.constant 1.000000e+00 : f32
    %275 = vector.broadcast %cst_97 : f32 to vector<8x128xf32>
    %276 = arith.addf %275, %274 : vector<8x128xf32>
    %cst_98 = arith.constant 5.000000e-01 : f32
    %277 = vector.broadcast %cst_98 : f32 to vector<8x128xf32>
    %278 = arith.mulf %277, %276 : vector<8x128xf32>
    %279 = vector.extract_strided_slice %262 {offsets = [0, 256], sizes = [8, 128], strides = [1, 1]} : vector<8x512xf32> to vector<8x128xf32>
    %280 = math.tanh %279 : vector<8x128xf32>
    %281 = vector.extract_strided_slice %262 {offsets = [0, 384], sizes = [8, 128], strides = [1, 1]} : vector<8x512xf32> to vector<8x128xf32>
    %cst_99 = arith.constant 5.000000e-01 : f32
    %282 = vector.broadcast %cst_99 : f32 to vector<8x128xf32>
    %283 = arith.mulf %282, %281 : vector<8x128xf32>
    %284 = math.tanh %283 : vector<8x128xf32>
    %cst_100 = arith.constant 1.000000e+00 : f32
    %285 = vector.broadcast %cst_100 : f32 to vector<8x128xf32>
    %286 = arith.addf %285, %284 : vector<8x128xf32>
    %cst_101 = arith.constant 5.000000e-01 : f32
    %287 = vector.broadcast %cst_101 : f32 to vector<8x128xf32>
    %288 = arith.mulf %287, %286 : vector<8x128xf32>
    %289 = arith.mulf %278, %255 : vector<8x128xf32>
    %290 = arith.mulf %270, %280 : vector<8x128xf32>
    %291 = arith.addf %289, %290 : vector<8x128xf32>
    %292 = math.tanh %291 : vector<8x128xf32>
    %293 = arith.mulf %288, %292 : vector<8x128xf32>
    %c8_i32 = arith.constant 8 : i32
    %c0_102 = arith.constant 0 : index
    %c0_103 = arith.constant 0 : index
    %294 = vector.load %arg7[%c0_102, %c0_103] : memref<8x128xf32, #tpu.memory_space<vmem>>, vector<8x128xf32>
    tpu.vector_store %arg7[%c0_102, %c0_103], %293 {strides = array<i32>} : memref<8x128xf32, #tpu.memory_space<vmem>>, vector<8x128xf32>,
    %c0_104 = arith.constant 0 : index
    %c0_105 = arith.constant 0 : index
    %295 = vector.load %arg8[%c0_104, %c0_105] : memref<8x128xf32, #tpu.memory_space<vmem>>, vector<8x128xf32>
    tpu.vector_store %arg8[%c0_104, %c0_105], %291 {strides = array<i32>} : memref<8x128xf32, #tpu.memory_space<vmem>>, vector<8x128xf32>,
    %c0_i32_106 = arith.constant 0 : i32
    %296 = arith.cmpi eq, %arg1, %c0_i32_106 : i32
    %297 = arith.extui %296 : i1 to i32
    %c0_i32_107 = arith.constant 0 : i32
    %298 = arith.cmpi ne, %297, %c0_i32_107 : i32
    scf.if %298 {
      %c0_108 = arith.constant 0 : index
      %c0_109 = arith.constant 0 : index
      %299 = vector.load %arg4[%c0_108, %c0_109] : memref<128x128xf32, #tpu.memory_space<vmem>>, vector<128x128xf32>
      %cst_110 = arith.constant dense<0.000000e+00> : vector<8x128xf32>
      %300 = tpu.matmul %293, %299, %cst_110 {dimension_numbers = #tpu.dot_dimension_numbers<[1], [0], [0], [1], [0, 0, 1, 1], [], []>} : vector<8x128xf32>, vector<128x128xf32>, vector<8x128xf32> -> vector<8x128xf32>
      %c0_111 = arith.constant 0 : index
      %c0_112 = arith.constant 0 : index
      %301 = vector.load %arg5[%c0_111, %c0_112] : memref<1x128xf32, #tpu.memory_space<vmem>>, vector<1x128xf32>
      %302 = vector.broadcast %301 : vector<1x128xf32> to vector<8x128xf32>
      %303 = arith.addf %300, %302 : vector<8x128xf32>
      %c0_113 = arith.constant 0 : index
      %c0_114 = arith.constant 0 : index
      %304 = vector.load %arg6[%c0_113, %c0_114] : memref<8x128xf32, #tpu.memory_space<vmem>>, vector<8x128xf32>
      tpu.vector_store %arg6[%c0_113, %c0_114], %303 {strides = array<i32>} : memref<8x128xf32, #tpu.memory_space<vmem>>, vector<8x128xf32>,
    } else {
    }
    return
  }
  func.func @transform_0(%arg0: i32, %arg1: i32) -> (i32, i32, i32) {
    %c0_i32 = arith.constant 0 : i32
    %c0_i32_0 = arith.constant 0 : i32
    return %arg1, %arg0, %c0_i32 : i32, i32, i32
  }
  func.func @transform_1(%arg0: i32, %arg1: i32) -> (i32, i32) {
    %c0_i32 = arith.constant 0 : i32
    %c0_i32_0 = arith.constant 0 : i32
    %c0_i32_1 = arith.constant 0 : i32
    return %c0_i32, %c0_i32_0 : i32, i32
  }
  func.func @transform_2(%arg0: i32, %arg1: i32) -> (i32, i32) {
    %c0_i32 = arith.constant 0 : i32
    %c0_i32_0 = arith.constant 0 : i32
    %c0_i32_1 = arith.constant 0 : i32
    return %c0_i32, %c0_i32_0 : i32, i32
  }
  func.func @transform_3(%arg0: i32, %arg1: i32) -> (i32, i32) {
    %c0_i32 = arith.constant 0 : i32
    %c0_i32_0 = arith.constant 0 : i32
    %c0_i32_1 = arith.constant 0 : i32
    return %c0_i32, %c0_i32_0 : i32, i32
  }
  func.func @transform_4(%arg0: i32, %arg1: i32) -> (i32, i32) {
    %c0_i32 = arith.constant 0 : i32
    %c0_i32_0 = arith.constant 0 : i32
    return %arg0, %c0_i32 : i32, i32
  }
}

</mosaic_0001>

<bundles_post_ra>
// kernel: tpu_custom_call.1
= control target key start
LH: loop header
LB: loop body
LE: loop exit
PB: predicated region body
PF: predicated region fallthrough
CT: control target
= control target key end

     0   :  { %9 = vsyncpa [#allocation5], 0  ;;  %s2153_s0 = inlined_call_operand.hbm [shape: f32[8,8,512], index: 0, kind: input, shape index: {}]   ;;  %s2154_s1 = inlined_call_operand.hbm [shape: f32[128,512], index: 1, kind: input, shape index: {}]   ;;  %s2155_s2 = inlined_call_operand.hbm [shape: f32[128,128], index: 2, kind: input, shape index: {}]   ;;  %s2156_s3 = inlined_call_operand.vmem [shape: f32[1,128], index: 3, kind: input, shape index: {}]   ;;  %s2157_s4 = inlined_call_operand.hbm [shape: f32[8,128], index: 4, kind: output, shape index: {}]  }
   0x1   :  { %10 = vsyncpa [#allocation8], 0 }
   0x2   :  { %11 = vsyncpa [#allocation6], 0  ;;  %s29_s17 = sshll.u32 %s2154_s1, 4  ;;  %s1312_s18 = smov [#allocation7]   ;;  %s30_s17 = int_to_ptr.hbm [resolvable:$true] %s29_s17 }
   0x3   :  { %s31_s19 = sshll.u32 %s1312_s18, 4  ;;  %s16_s22 = sshll.u32 %s2153_s0, 4  ;;  %s32_s19 = int_to_ptr.vmem [resolvable:$true] %s31_s19  ;;  %s17_s22 = int_to_ptr.hbm [resolvable:$true] %s16_s22 }
   0x4   :  { %s1313_s23 = smov 512   ;;  %s1314_s24 = smov 32  }
   0x5   :  { %37 = dma.hbm_to_vmem [thread:$0]  %s30_s17, 8192, %s32_s19, [#allocation8], %s1313_s23, %s1313_s23, %s1314_s24  }
   0x6   :  { %s1315_s25 = smov [#allocation4]   ;;  %s42_s29 = sshll.u32 %s2155_s2, 4  ;;  %s43_s29 = int_to_ptr.hbm [resolvable:$true] %s42_s29 }
   0x7   :  { %s18_s26 = sshll.u32 %s1315_s25, 4  ;;  %s1316_s1 = smov [#allocation9]   ;;  %s19_s26 = int_to_ptr.vmem [resolvable:$true] %s18_s26 }
   0x8   :  { %24 = dma.hbm_to_vmem [thread:$0]  %s17_s22, 4096, %s19_s26, [#allocation5], %s1313_s23, %s1313_s23, %s1314_s24  }
   0x9   :  { %s44_s30 = sshll.u32 %s1316_s1, 4  ;;  %s1317_s5 = smov 128   ;;  %s45_s30 = int_to_ptr.vmem [resolvable:$true] %s44_s30 }
   0xa   :  { %s1318_s6 = smov 8  }
   0xb   :  { %50 = dma.hbm_to_vmem [thread:$0]  %s43_s29, 2048, %s45_s30, [#allocation8], %s1317_s5, %s1317_s5, %s1318_s6  }
   0xc   :  { %1306 = dma.done.wait [#allocation5], 4096  }
   0xd   :  { %1307 = vsyncadd [#allocation5], 4294963200 }
   0xe   :  { %1308 = dma.done.wait [#allocation8], 10240  }
   0xf   :  { %1309 = vsyncadd [#allocation8], 4294957056  ;;  %v1355_v0 = vld [vmem:[#allocation7 + $0x1e0] sm:$0xff]  ;;  %v1357_v1 = vld [vmem:[#allocation7 + $0x1e8] sm:$0xff]  ;;  %v1319_v63 = vmov 0.0   ;;  %s1320_s7 = smov [#allocation10]  }
  0x10   :  { %v1359_v2 = vld [vmem:[#allocation7 + $0x1f0] sm:$0xff]  ;;  %141 = vmatpush.msra.mxu0 %v1355_v0  ;;  %161 = vmatpush.msra.mxu1 %v1357_v1  ;;  %v1363_v3 = vld [vmem:[#allocation7 + $0x1c0] sm:$0xff]  ;;  %v1365_v4 = vld [vmem:[#allocation7 + $0x1c8] sm:$0xff]  ;;  %s1043_s8 = sshll.u32 %s1320_s7, 4  ;;  %s1045_s11 = sshll.u32 %s2157_s4, 4  ;;  %s1044_s8 = int_to_ptr.vmem [resolvable:$true] %s1043_s8  ;;  %s1046_s11 = int_to_ptr.hbm [resolvable:$true] %s1045_s11 }
  0x11   :  { %v1367_v5 = vld [vmem:[#allocation7 + $0x1d0] sm:$0xff]  ;;  %181 = vmatpush.msra.mxu2 %v1359_v2  ;;  %v1370_v6 = vld [vmem:[#allocation7 + $0x1a0] sm:$0xff]  ;;  %v1372_v7 = vld [vmem:[#allocation7 + $0x1a8] sm:$0xff] }
  0x12   :  { %142 = vmatpush.msra.mxu0 %v1363_v3  ;;  %162 = vmatpush.msra.mxu1 %v1365_v4  ;;  %v1376_v8 = vld [vmem:[#allocation7 + $0x1b0] sm:$0xff]  ;;  %v1378_v9 = vld [vmem:[#allocation7 + $0x1f8] sm:$0xff]  ;;  %v1382_v10 = vld [vmem:[#allocation7 + $0x180] sm:$0xff] }
  0x13   :  { %182 = vmatpush.msra.mxu2 %v1367_v5  ;;  %201 = vmatpush.msra.mxu3 %v1378_v9  ;;  %v1384_v11 = vld [vmem:[#allocation7 + $0x188] sm:$0xff]  ;;  %v1386_v12 = vld [vmem:[#allocation7 + $0x1d8] sm:$0xff]  ;;  %v1390_v13 = vld [vmem:[#allocation7 + $0x190] sm:$0xff] }
  0x14   :  { %143 = vmatpush.msra.mxu0 %v1370_v6  ;;  %163 = vmatpush.msra.mxu1 %v1372_v7  ;;  %v1392_v14 = vld [vmem:[#allocation7 + $0x1b8] sm:$0xff]  ;;  %v1396_v15 = vld [vmem:[#allocation7 + $0x160] sm:$0xff]  ;;  %v1398_v16 = vld [vmem:[#allocation7 + $0x168] sm:$0xff] }
  0x15   :  { %183 = vmatpush.msra.mxu2 %v1376_v8  ;;  %202 = vmatpush.msra.mxu3 %v1386_v12  ;;  %v1402_v17 = vld [vmem:[#allocation7 + $0x170] sm:$0xff]  ;;  %v1404_v18 = vld [vmem:[#allocation7 + $0x198] sm:$0xff]  ;;  %v1408_v19 = vld [vmem:[#allocation7 + $0x140] sm:$0xff] }
  0x16   :  { %144 = vmatpush.msra.mxu0 %v1382_v10  ;;  %164 = vmatpush.msra.mxu1 %v1384_v11  ;;  %v1410_v20 = vld [vmem:[#allocation7 + $0x148] sm:$0xff]  ;;  %v1414_v21 = vld [vmem:[#allocation7 + $0x150] sm:$0xff]  ;;  %v1416_v22 = vld [vmem:[#allocation7 + $0x178] sm:$0xff] }
  0x17   :  { %184 = vmatpush.msra.mxu2 %v1390_v13  ;;  %203 = vmatpush.msra.mxu3 %v1392_v14  ;;  %v1420_v23 = vld [vmem:[#allocation7 + $0x120] sm:$0xff]  ;;  %v1422_v24 = vld [vmem:[#allocation7 + $0x128] sm:$0xff]  ;;  %v1426_v25 = vld [vmem:[#allocation7 + $0x130] sm:$0xff] }
  0x18   :  { %145 = vmatpush.msra.mxu0 %v1396_v15  ;;  %165 = vmatpush.msra.mxu1 %v1398_v16  ;;  %v1428_v26 = vld [vmem:[#allocation7 + $0x158] sm:$0xff]  ;;  %v1432_v27 = vld [vmem:[#allocation7 + $0x100] sm:$0xff]  ;;  %v1434_v28 = vld [vmem:[#allocation7 + $0x108] sm:$0xff] }
  0x19   :  { %185 = vmatpush.msra.mxu2 %v1402_v17  ;;  %204 = vmatpush.msra.mxu3 %v1404_v18  ;;  %v1438_v29 = vld [vmem:[#allocation7 + $0x110] sm:$0xff]  ;;  %v1440_v30 = vld [vmem:[#allocation7 + $0x138] sm:$0xff]  ;;  %v1444_v31 = vld [vmem:[#allocation7 + $0xe0] sm:$0xff] }
  0x1a   :  { %146 = vmatpush.msra.mxu0 %v1408_v19  ;;  %166 = vmatpush.msra.mxu1 %v1410_v20  ;;  %v1446_v32 = vld [vmem:[#allocation7 + $0xe8] sm:$0xff]  ;;  %v1450_v33 = vld [vmem:[#allocation7 + $0xf0] sm:$0xff]  ;;  %v1452_v34 = vld [vmem:[#allocation7 + $0x118] sm:$0xff] }
  0x1b   :  { %186 = vmatpush.msra.mxu2 %v1414_v21  ;;  %205 = vmatpush.msra.mxu3 %v1416_v22  ;;  %v1456_v35 = vld [vmem:[#allocation7 + $0xc0] sm:$0xff]  ;;  %v1458_v36 = vld [vmem:[#allocation7 + $0xc8] sm:$0xff]  ;;  %v1462_v37 = vld [vmem:[#allocation7 + $0xd0] sm:$0xff] }
  0x1c   :  { %147 = vmatpush.msra.mxu0 %v1420_v23  ;;  %167 = vmatpush.msra.mxu1 %v1422_v24  ;;  %v1464_v38 = vld [vmem:[#allocation7 + $0xf8] sm:$0xff]  ;;  %v1468_v39 = vld [vmem:[#allocation7 + $0xa0] sm:$0xff]  ;;  %v1470_v40 = vld [vmem:[#allocation7 + $0xa8] sm:$0xff] }
  0x1d   :  { %187 = vmatpush.msra.mxu2 %v1426_v25  ;;  %206 = vmatpush.msra.mxu3 %v1428_v26  ;;  %v1474_v41 = vld [vmem:[#allocation7 + $0xb0] sm:$0xff]  ;;  %v1476_v42 = vld [vmem:[#allocation7 + $0xd8] sm:$0xff]  ;;  %v1480_v43 = vld [vmem:[#allocation7 + $0x80] sm:$0xff] }
  0x1e   :  { %148 = vmatpush.msra.mxu0 %v1432_v27  ;;  %168 = vmatpush.msra.mxu1 %v1434_v28  ;;  %2222 = vst [vmem:[#allocation14_spill] sm:$0xff] %v1480_v43  ;;  %v1482_v44 = vld [vmem:[#allocation7 + $0x88] sm:$0xff]  ;;  %v1486_v45 = vld [vmem:[#allocation7 + $0x90] sm:$0xff]  ;;  %v1488_v46 = vld [vmem:[#allocation7 + $0xb8] sm:$0xff] }
  0x1f   :  { %188 = vmatpush.msra.mxu2 %v1438_v29  ;;  %207 = vmatpush.msra.mxu3 %v1440_v30  ;;  %2223 = vst [vmem:[#allocation15_spill] sm:$0xff] %v1482_v44  ;;  %v1492_v47 = vld [vmem:[#allocation7 + $0x60] sm:$0xff]  ;;  %v1494_v48 = vld [vmem:[#allocation7 + $0x68] sm:$0xff]  ;;  %v1498_v49 = vld [vmem:[#allocation7 + $0x70] sm:$0xff] }
  0x20   :  { %149 = vmatpush.msra.mxu0 %v1444_v31  ;;  %169 = vmatpush.msra.mxu1 %v1446_v32  ;;  %2224 = vst [vmem:[#allocation16_spill] sm:$0xff] %v1486_v45  ;;  %v1500_v50 = vld [vmem:[#allocation7 + $0x98] sm:$0xff]  ;;  %v1504_v51 = vld [vmem:[#allocation7 + $0x40] sm:$0xff]  ;;  %v1506_v52 = vld [vmem:[#allocation7 + $0x48] sm:$0xff] }
  0x21   :  { %189 = vmatpush.msra.mxu2 %v1450_v33  ;;  %208 = vmatpush.msra.mxu3 %v1452_v34  ;;  %2225 = vst [vmem:[#allocation17_spill] sm:$0xff] %v1488_v46  ;;  %v1510_v53 = vld [vmem:[#allocation7 + $0x50] sm:$0xff]  ;;  %v1512_v54 = vld [vmem:[#allocation7 + $0x78] sm:$0xff]  ;;  %v1516_v55 = vld [vmem:[#allocation7 + $0x20] sm:$0xff] }
  0x22   :  { %150 = vmatpush.msra.mxu0 %v1456_v35  ;;  %170 = vmatpush.msra.mxu1 %v1458_v36  ;;  %2226 = vst [vmem:[#allocation18_spill] sm:$0xff] %v1492_v47  ;;  %v1518_v56 = vld [vmem:[#allocation7 + $0x28] sm:$0xff]  ;;  %v1522_v57 = vld [vmem:[#allocation7 + $0x30] sm:$0xff]  ;;  %v1524_v58 = vld [vmem:[#allocation7 + $0x58] sm:$0xff] }
  0x23   :  { %190 = vmatpush.msra.mxu2 %v1462_v37  ;;  %209 = vmatpush.msra.mxu3 %v1464_v38  ;;  %2227 = vst [vmem:[#allocation19_spill] sm:$0xff] %v1494_v48  ;;  %v1528_v59 = vld [vmem:[#allocation7] sm:$0xff]  ;;  %v1530_v60 = vld [vmem:[#allocation7 + $0x8] sm:$0xff]  ;;  %v1534_v61 = vld [vmem:[#allocation7 + $0x10] sm:$0xff] }
  0x24   :  { %151 = vmatpush.msra.mxu0 %v1468_v39  ;;  %171 = vmatpush.msra.mxu1 %v1470_v40  ;;  %2228 = vst [vmem:[#allocation20_spill] sm:$0xff] %v1498_v49  ;;  %v1540_v62 = vld [vmem:[#allocation7 + $0x38] sm:$0xff] }
  0x25   :  { %191 = vmatpush.msra.mxu2 %v1474_v41  ;;  %210 = vmatpush.msra.mxu3 %v1476_v42  ;;  %2229 = vst [vmem:[#allocation21_spill] sm:$0xff] %v1500_v50 }
  0x26   :  { %152 = vmatpush.msra.mxu0 %v1480_v43  ;;  %172 = vmatpush.msra.mxu1 %v1482_v44  ;;  %2230 = vst [vmem:[#allocation22_spill] sm:$0xff] %v1504_v51 }
  0x27   :  { %192 = vmatpush.msra.mxu2 %v1486_v45  ;;  %211 = vmatpush.msra.mxu3 %v1488_v46  ;;  %2231 = vst [vmem:[#allocation23_spill] sm:$0xff] %v1506_v52 }
  0x28   :  { %153 = vmatpush.msra.mxu0 %v1492_v47  ;;  %173 = vmatpush.msra.mxu1 %v1494_v48  ;;  %2232 = vst [vmem:[#allocation24_spill] sm:$0xff] %v1510_v53 }
  0x29   :  { %2233 = vst [vmem:[#allocation25_spill] sm:$0xff] %v1512_v54  ;;  %193 = vmatpush.msra.mxu2 %v1498_v49  ;;  %212 = vmatpush.msra.mxu3 %v1500_v50 }
  0x2a   :  { %2234 = vst [vmem:[#allocation26_spill] sm:$0xff] %v1516_v55  ;;  %154 = vmatpush.msra.mxu0 %v1504_v51  ;;  %174 = vmatpush.msra.mxu1 %v1506_v52 }
  0x2b   :  { %2235 = vst [vmem:[#allocation27_spill] sm:$0xff] %v1518_v56  ;;  %194 = vmatpush.msra.mxu2 %v1510_v53  ;;  %213 = vmatpush.msra.mxu3 %v1512_v54 }
  0x2c   :  { %2236 = vst [vmem:[#allocation28_spill] sm:$0xff] %v1522_v57  ;;  %155 = vmatpush.msra.mxu0 %v1516_v55  ;;  %175 = vmatpush.msra.mxu1 %v1518_v56  ;;  %v1543_v55 = vld [vmem:[#allocation7 + $0x18] sm:$0xff] }
  0x2d   :  { %2237 = vst [vmem:[#allocation29_spill] sm:$0xff] %v1524_v58  ;;  %195 = vmatpush.msra.mxu2 %v1522_v57  ;;  %214 = vmatpush.msra.mxu3 %v1524_v58 }
  0x2e   :  { %2238 = vst [vmem:[#allocation30_spill] sm:$0xff] %v1528_v59  ;;  %156 = vmatpush.msra.mxu0 %v1528_v59  ;;  %176 = vmatpush.msra.mxu1 %v1530_v60 }
  0x2f   :  { %2239 = vst [vmem:[#allocation31_spill] sm:$0xff] %v1530_v60  ;;  %196 = vmatpush.msra.mxu2 %v1534_v61  ;;  %157 = vmatmul.f32.vlgmr.msra.gmra.mxu0 %v1319_v63 }
  0x30   :  { %2240 = vst [vmem:[#allocation32_spill] sm:$0xff] %v1534_v61  ;;  %177 = vmatmul.f32.vlgmr.msra.gmra.mxu1 %v1319_v63  ;;  %197 = vmatmul.f32.vlgmr.msra.gmra.mxu2 %v1319_v63 }
  0x31   :  { %2241 = vst [vmem:[#allocation33_spill] sm:$0xff] %v1540_v62  ;;  %215 = vmatpush.msra.mxu3 %v1540_v62  ;;  %248 = vmatpush.msrb.mxu0 %v1355_v0 }
  0x32   :  { %2242 = vst [vmem:[#allocation34_spill] sm:$0xff] %v1543_v55  ;;  %268 = vmatpush.msrb.mxu1 %v1357_v1  ;;  %288 = vmatpush.msrb.mxu2 %v1359_v2 }
  0x33   :  { %216 = vmatpush.msra.mxu3 %v1543_v55  ;;  %249 = vmatpush.msrb.mxu0 %v1363_v3 }
  0x34   :  { %217 = vmatmul.f32.vlgmr.msra.gmra.mxu3 %v1319_v63  ;;  %269 = vmatpush.msrb.mxu1 %v1365_v4  ;;  %v2243_v63 = vld [vmem:[#allocation26_spill] sm:$0xff] }
  0x35   :  { %308 = vmatpush.msrb.mxu3 %v1378_v9  ;;  %289 = vmatpush.msrb.mxu2 %v1367_v5 }
  0x36   :  { %250 = vmatpush.msrb.mxu0 %v1370_v6  ;;  %270 = vmatpush.msrb.mxu1 %v1372_v7 }
  0x37   :  { %309 = vmatpush.msrb.mxu3 %v1386_v12  ;;  %290 = vmatpush.msrb.mxu2 %v1376_v8 }
  0x38   :  { %251 = vmatpush.msrb.mxu0 %v1382_v10  ;;  %271 = vmatpush.msrb.mxu1 %v1384_v11 }
  0x39   :  { %310 = vmatpush.msrb.mxu3 %v1392_v14  ;;  %291 = vmatpush.msrb.mxu2 %v1390_v13 }
  0x3a   :  { %252 = vmatpush.msrb.mxu0 %v1396_v15  ;;  %272 = vmatpush.msrb.mxu1 %v1398_v16 }
  0x3b   :  { %311 = vmatpush.msrb.mxu3 %v1404_v18  ;;  %292 = vmatpush.msrb.mxu2 %v1402_v17 }
  0x3c   :  { %253 = vmatpush.msrb.mxu0 %v1408_v19  ;;  %273 = vmatpush.msrb.mxu1 %v1410_v20 }
  0x3d   :  { %312 = vmatpush.msrb.mxu3 %v1416_v22  ;;  %293 = vmatpush.msrb.mxu2 %v1414_v21 }
  0x3e   :  { %254 = vmatpush.msrb.mxu0 %v1420_v23  ;;  %274 = vmatpush.msrb.mxu1 %v1422_v24 }
  0x3f   :  { %313 = vmatpush.msrb.mxu3 %v1428_v26  ;;  %294 = vmatpush.msrb.mxu2 %v1426_v25 }
  0x40   :  { %255 = vmatpush.msrb.mxu0 %v1432_v27  ;;  %275 = vmatpush.msrb.mxu1 %v1434_v28 }
  0x41   :  { %314 = vmatpush.msrb.mxu3 %v1440_v30  ;;  %295 = vmatpush.msrb.mxu2 %v1438_v29 }
  0x42   :  { %256 = vmatpush.msrb.mxu0 %v1444_v31  ;;  %276 = vmatpush.msrb.mxu1 %v1446_v32 }
  0x43   :  { %315 = vmatpush.msrb.mxu3 %v1452_v34  ;;  %296 = vmatpush.msrb.mxu2 %v1450_v33 }
  0x44   :  { %257 = vmatpush.msrb.mxu0 %v1456_v35  ;;  %277 = vmatpush.msrb.mxu1 %v1458_v36 }
  0x45   :  { %316 = vmatpush.msrb.mxu3 %v1464_v38  ;;  %297 = vmatpush.msrb.mxu2 %v1462_v37 }
  0x46   :  { %258 = vmatpush.msrb.mxu0 %v1468_v39  ;;  %278 = vmatpush.msrb.mxu1 %v1470_v40 }
  0x47   :  { %317 = vmatpush.msrb.mxu3 %v1476_v42  ;;  %298 = vmatpush.msrb.mxu2 %v1474_v41 }
  0x48   :  { %259 = vmatpush.msrb.mxu0 %v1480_v43  ;;  %279 = vmatpush.msrb.mxu1 %v1482_v44 }
  0x49   :  { %318 = vmatpush.msrb.mxu3 %v1488_v46  ;;  %299 = vmatpush.msrb.mxu2 %v1486_v45 }
  0x4a   :  { %260 = vmatpush.msrb.mxu0 %v1492_v47  ;;  %280 = vmatpush.msrb.mxu1 %v1494_v48 }
  0x4b   :  { %319 = vmatpush.msrb.mxu3 %v1500_v50  ;;  %300 = vmatpush.msrb.mxu2 %v1498_v49 }
  0x4c   :  { %261 = vmatpush.msrb.mxu0 %v1504_v51  ;;  %281 = vmatpush.msrb.mxu1 %v1506_v52 }
  0x4d   :  { %320 = vmatpush.msrb.mxu3 %v1512_v54  ;;  %301 = vmatpush.msrb.mxu2 %v1510_v53 }
  0x4e   :  { %262 = vmatpush.msrb.mxu0 %v2243_v63  ;;  %282 = vmatpush.msrb.mxu1 %v1518_v56 }
  0x4f   :  { %321 = vmatpush.msrb.mxu3 %v1524_v58  ;;  %302 = vmatpush.msrb.mxu2 %v1522_v57 }
  0x50   :  { %263 = vmatpush.msrb.mxu0 %v1528_v59  ;;  %283 = vmatpush.msrb.mxu1 %v1530_v60 }
  0x51   :  { %322 = vmatpush.msrb.mxu3 %v1540_v62  ;;  %303 = vmatpush.msrb.mxu2 %v1534_v61 }
  0x52   :  { %355 = vmatpush.msra.mxu0 %v1355_v0  ;;  %375 = vmatpush.msra.mxu1 %v1357_v1 }
  0x53   :  { %323 = vmatpush.msrb.mxu3 %v1543_v55  ;;  %395 = vmatpush.msra.mxu2 %v1359_v2 }
  0x54   :  { %356 = vmatpush.msra.mxu0 %v1363_v3  ;;  %376 = vmatpush.msra.mxu1 %v1365_v4 }
  0x55   :  { %415 = vmatpush.msra.mxu3 %v1378_v9  ;;  %396 = vmatpush.msra.mxu2 %v1367_v5 }
  0x56   :  { %357 = vmatpush.msra.mxu0 %v1370_v6  ;;  %377 = vmatpush.msra.mxu1 %v1372_v7 }
  0x57   :  { %416 = vmatpush.msra.mxu3 %v1386_v12  ;;  %397 = vmatpush.msra.mxu2 %v1376_v8 }
  0x58   :  { %358 = vmatpush.msra.mxu0 %v1382_v10  ;;  %378 = vmatpush.msra.mxu1 %v1384_v11 }
  0x59   :  { %417 = vmatpush.msra.mxu3 %v1392_v14  ;;  %398 = vmatpush.msra.mxu2 %v1390_v13 }
  0x5a   :  { %359 = vmatpush.msra.mxu0 %v1396_v15  ;;  %379 = vmatpush.msra.mxu1 %v1398_v16 }
  0x5b   :  { %418 = vmatpush.msra.mxu3 %v1404_v18  ;;  %399 = vmatpush.msra.mxu2 %v1402_v17 }
  0x5c   :  { %360 = vmatpush.msra.mxu0 %v1408_v19  ;;  %380 = vmatpush.msra.mxu1 %v1410_v20 }
  0x5d   :  { %419 = vmatpush.msra.mxu3 %v1416_v22  ;;  %400 = vmatpush.msra.mxu2 %v1414_v21 }
  0x5e   :  { %361 = vmatpush.msra.mxu0 %v1420_v23  ;;  %381 = vmatpush.msra.mxu1 %v1422_v24 }
  0x5f   :  { %420 = vmatpush.msra.mxu3 %v1428_v26  ;;  %401 = vmatpush.msra.mxu2 %v1426_v25 }
  0x60   :  { %362 = vmatpush.msra.mxu0 %v1432_v27  ;;  %382 = vmatpush.msra.mxu1 %v1434_v28 }
  0x61   :  { %421 = vmatpush.msra.mxu3 %v1440_v30  ;;  %402 = vmatpush.msra.mxu2 %v1438_v29 }
  0x62   :  { %363 = vmatpush.msra.mxu0 %v1444_v31  ;;  %383 = vmatpush.msra.mxu1 %v1446_v32 }
  0x63   :  { %422 = vmatpush.msra.mxu3 %v1452_v34  ;;  %403 = vmatpush.msra.mxu2 %v1450_v33 }
  0x64   :  { %364 = vmatpush.msra.mxu0 %v1456_v35  ;;  %384 = vmatpush.msra.mxu1 %v1458_v36 }
  0x65   :  { %423 = vmatpush.msra.mxu3 %v1464_v38  ;;  %404 = vmatpush.msra.mxu2 %v1462_v37 }
  0x66   :  { %365 = vmatpush.msra.mxu0 %v1468_v39  ;;  %385 = vmatpush.msra.mxu1 %v1470_v40 }
  0x67   :  { %424 = vmatpush.msra.mxu3 %v1476_v42  ;;  %405 = vmatpush.msra.mxu2 %v1474_v41 }
  0x68   :  { %366 = vmatpush.msra.mxu0 %v1480_v43  ;;  %386 = vmatpush.msra.mxu1 %v1482_v44 }
  0x69   :  { %425 = vmatpush.msra.mxu3 %v1488_v46  ;;  %406 = vmatpush.msra.mxu2 %v1486_v45 }
  0x6a   :  { %367 = vmatpush.msra.mxu0 %v1492_v47  ;;  %387 = vmatpush.msra.mxu1 %v1494_v48 }
  0x6b   :  { %426 = vmatpush.msra.mxu3 %v1500_v50  ;;  %407 = vmatpush.msra.mxu2 %v1498_v49 }
  0x6c   :  { %368 = vmatpush.msra.mxu0 %v1504_v51  ;;  %388 = vmatpush.msra.mxu1 %v1506_v52  ;;  %v137_v52 = vld [vmem:[#allocation4] sm:$0xff] }
  0x6d   :  { %427 = vmatpush.msra.mxu3 %v1512_v54  ;;  %408 = vmatpush.msra.mxu2 %v1510_v53  ;;  %v138_v53 = vld [vmem:[#allocation4 + $0x8] sm:$0xff] }
  0x6e   :  { %369 = vmatpush.msra.mxu0 %v2243_v63  ;;  %389 = vmatpush.msra.mxu1 %v1518_v56 }
  0x6f   :  { %428 = vmatpush.msra.mxu3 %v1524_v58  ;;  %409 = vmatpush.msra.mxu2 %v1522_v57  ;;  %v139_v57 = vld [vmem:[#allocation4 + $0x10] sm:$0xff] }
  0x70   :  { %370 = vmatpush.msra.mxu0 %v1528_v59  ;;  %390 = vmatpush.msra.mxu1 %v1530_v60  ;;  %v140_v59 = vld [vmem:[#allocation4 + $0x18] sm:$0xff] }
  0x71   :  { %429 = vmatpush.msra.mxu3 %v1540_v62  ;;  %410 = vmatpush.msra.mxu2 %v1534_v61 }
  0x73   :  { %430 = vmatpush.msra.mxu3 %v1543_v55 }
  0xac   :  { %v158_v51 = vpop.f32.mrf.mxu0 }
  0xad   :  { %v221_v58 = vadd.f32 %v158_v51, %v137_v52  ;;  %v178_v54 = vpop.f32.mrf.mxu1 }
  0xae   :  { %v222_v63 = vadd.f32 %v178_v54, %v138_v53 }
  0xaf   :  { %v225_v49 = vmul.f32 0.5, %v221_v58 }
  0xb0   :  { %v229_v56 = vmul.f32 0.5, %v222_v63  ;;  %v2253_v63 = vld [vmem:[#allocation23_spill] sm:$0xff] }
  0xb1   :  { %1066 = vtanh.f32 %v225_v49 }
  0xb2   :  { %1068 = vtanh.f32 %v229_v56 }
  0xb3   :  { %v198_v62 = vpop.f32.mrf.mxu2 }
  0xb4   :  { %v223_v48 = vadd.f32 %v198_v62, %v139_v57 }
  0xb6   :  { %1070 = vtanh.f32 %v223_v48 }
  0xb7   :  { %v1067_v60 = vpop.eup %1066  ;;  %v218_v47 = vpop.f32.mrf.mxu3 }
  0xb8   :  { %v1069_v61 = vpop.eup %1068  ;;  %v227_v50 = vadd.f32 1.0, %v1067_v60  ;;  %v224_v55 = vadd.f32 %v218_v47, %v140_v59  ;;  %v2247_v47 = vld [vmem:[#allocation21_spill] sm:$0xff]  ;;  %v2250_v59 = vld [vmem:[#allocation20_spill] sm:$0xff] }
  0xb9   :  { %v231_v45 = vadd.f32 1.0, %v1069_v61  ;;  %v2251_v60 = vld [vmem:[#allocation25_spill] sm:$0xff]  ;;  %v2252_v61 = vld [vmem:[#allocation22_spill] sm:$0xff] }
  0xba   :  { %v228_v44 = vmul.f32 0.5, %v227_v50  ;;  %v234_v43 = vmul.f32 0.5, %v224_v55  ;;  %v2248_v50 = vld [vmem:[#allocation18_spill] sm:$0xff]  ;;  %v2249_v55 = vld [vmem:[#allocation19_spill] sm:$0xff] }
  0xbb   :  { %v232_v51 = vmul.f32 0.5, %v231_v45  ;;  %v2246_v45 = vld [vmem:[#allocation16_spill] sm:$0xff] }
  0xbc   :  { %v1071_v52 = vpop.eup %1070  ;;  %1072 = vtanh.f32 %v234_v43  ;;  %v2244_v43 = vld [vmem:[#allocation14_spill] sm:$0xff] }
  0xbd   :  { %v238_v53 = vmul.f32 0.0, %v232_v51  ;;  %v239_v54 = vmul.f32 %v1071_v52, %v228_v44  ;;  %v2245_v44 = vld [vmem:[#allocation15_spill] sm:$0xff]  ;;  %v2254_v51 = vld [vmem:[#allocation24_spill] sm:$0xff]  ;;  %v2255_v52 = vld [vmem:[#allocation29_spill] sm:$0xff] }
  0xbf   :  { %v1675_v49 = vadd.f32 %v239_v54, %v238_v53  ;;  %v2256_v53 = vld [vmem:[#allocation26_spill] sm:$0xff]  ;;  %v2257_v54 = vld [vmem:[#allocation27_spill] sm:$0xff] }
  0xc1   :  { %1074 = vtanh.f32 %v1675_v49 }
  0xc2   :  { %v1073_v56 = vpop.eup %1072 }
  0xc3   :  { %v236_v57 = vadd.f32 1.0, %v1073_v56  ;;  %v2258_v56 = vld [vmem:[#allocation28_spill] sm:$0xff] }
  0xc5   :  { %v237_v48 = vmul.f32 0.5, %v236_v57  ;;  %v2259_v57 = vld [vmem:[#allocation33_spill] sm:$0xff] }
  0xc7   :  { %v1075_v58 = vpop.eup %1074 }
  0xc8   :  { %v242_v62 = vmul.f32 %v1075_v58, %v237_v48  ;;  %v2260_v48 = vld [vmem:[#allocation30_spill] sm:$0xff]  ;;  %v2261_v58 = vld [vmem:[#allocation31_spill] sm:$0xff] }
  0xca   :  { %264 = vmatmul.f32.vlgmr.msrb.gmra.mxu0 %v242_v62  ;;  %284 = vmatmul.f32.vlgmr.msrb.gmra.mxu1 %v242_v62 }
  0xcb   :  { %304 = vmatmul.f32.vlgmr.msrb.gmra.mxu2 %v242_v62  ;;  %324 = vmatmul.f32.vlgmr.msrb.gmra.mxu3 %v242_v62  ;;  %v2262_v62 = vld [vmem:[#allocation32_spill] sm:$0xff] }
  0xcc   :  { %462 = vmatpush.msrb.mxu0 %v1355_v0  ;;  %482 = vmatpush.msrb.mxu1 %v1357_v1 }
  0xcd   :  { %502 = vmatpush.msrb.mxu2 %v1359_v2  ;;  %522 = vmatpush.msrb.mxu3 %v1378_v9 }
  0xce   :  { %463 = vmatpush.msrb.mxu0 %v1363_v3  ;;  %483 = vmatpush.msrb.mxu1 %v1365_v4 }
  0xcf   :  { %503 = vmatpush.msrb.mxu2 %v1367_v5  ;;  %523 = vmatpush.msrb.mxu3 %v1386_v12 }
  0xd0   :  { %464 = vmatpush.msrb.mxu0 %v1370_v6  ;;  %484 = vmatpush.msrb.mxu1 %v1372_v7 }
  0xd1   :  { %504 = vmatpush.msrb.mxu2 %v1376_v8  ;;  %524 = vmatpush.msrb.mxu3 %v1392_v14 }
  0xd2   :  { %465 = vmatpush.msrb.mxu0 %v1382_v10  ;;  %485 = vmatpush.msrb.mxu1 %v1384_v11 }
  0xd3   :  { %505 = vmatpush.msrb.mxu2 %v1390_v13  ;;  %525 = vmatpush.msrb.mxu3 %v1404_v18 }
  0xd4   :  { %466 = vmatpush.msrb.mxu0 %v1396_v15  ;;  %486 = vmatpush.msrb.mxu1 %v1398_v16 }
  0xd5   :  { %506 = vmatpush.msrb.mxu2 %v1402_v17  ;;  %526 = vmatpush.msrb.mxu3 %v1416_v22 }
  0xd6   :  { %467 = vmatpush.msrb.mxu0 %v1408_v19  ;;  %487 = vmatpush.msrb.mxu1 %v1410_v20 }
  0xd7   :  { %507 = vmatpush.msrb.mxu2 %v1414_v21  ;;  %527 = vmatpush.msrb.mxu3 %v1428_v26 }
  0xd8   :  { %468 = vmatpush.msrb.mxu0 %v1420_v23  ;;  %488 = vmatpush.msrb.mxu1 %v1422_v24 }
  0xd9   :  { %508 = vmatpush.msrb.mxu2 %v1426_v25  ;;  %528 = vmatpush.msrb.mxu3 %v1440_v30 }
  0xda   :  { %469 = vmatpush.msrb.mxu0 %v1432_v27  ;;  %489 = vmatpush.msrb.mxu1 %v1434_v28 }
  0xdb   :  { %509 = vmatpush.msrb.mxu2 %v1438_v29  ;;  %529 = vmatpush.msrb.mxu3 %v1452_v34 }
  0xdc   :  { %470 = vmatpush.msrb.mxu0 %v1444_v31  ;;  %490 = vmatpush.msrb.mxu1 %v1446_v32 }
  0xdd   :  { %510 = vmatpush.msrb.mxu2 %v1450_v33  ;;  %530 = vmatpush.msrb.mxu3 %v1464_v38 }
  0xde   :  { %471 = vmatpush.msrb.mxu0 %v1456_v35  ;;  %491 = vmatpush.msrb.mxu1 %v1458_v36 }
  0xdf   :  { %511 = vmatpush.msrb.mxu2 %v1462_v37  ;;  %531 = vmatpush.msrb.mxu3 %v1476_v42 }
  0xe0   :  { %472 = vmatpush.msrb.mxu0 %v1468_v39  ;;  %492 = vmatpush.msrb.mxu1 %v1470_v40 }
  0xe1   :  { %512 = vmatpush.msrb.mxu2 %v1474_v41  ;;  %532 = vmatpush.msrb.mxu3 %v1488_v46 }
  0xe2   :  { %473 = vmatpush.msrb.mxu0 %v2244_v43  ;;  %493 = vmatpush.msrb.mxu1 %v2245_v44 }
  0xe3   :  { %513 = vmatpush.msrb.mxu2 %v2246_v45  ;;  %533 = vmatpush.msrb.mxu3 %v2247_v47 }
  0xe4   :  { %474 = vmatpush.msrb.mxu0 %v2248_v50  ;;  %494 = vmatpush.msrb.mxu1 %v2249_v55  ;;  %v247_v50 = vld [vmem:[#allocation4 + $0x38] sm:$0xff] }
  0xe5   :  { %514 = vmatpush.msrb.mxu2 %v2250_v59  ;;  %534 = vmatpush.msrb.mxu3 %v2251_v60 }
  0xe6   :  { %475 = vmatpush.msrb.mxu0 %v2252_v61  ;;  %495 = vmatpush.msrb.mxu1 %v2253_v63  ;;  %v2263_v61 = vld [vmem:[#allocation34_spill] sm:$0xff]  ;;  %v244_v63 = vld [vmem:[#allocation4 + $0x20] sm:$0xff] }
  0xe7   :  { %515 = vmatpush.msrb.mxu2 %v2254_v51  ;;  %535 = vmatpush.msrb.mxu3 %v2255_v52  ;;  %v245_v51 = vld [vmem:[#allocation4 + $0x28] sm:$0xff] }
  0xe8   :  { %476 = vmatpush.msrb.mxu0 %v2256_v53  ;;  %496 = vmatpush.msrb.mxu1 %v2257_v54 }
  0xe9   :  { %516 = vmatpush.msrb.mxu2 %v2258_v56  ;;  %536 = vmatpush.msrb.mxu3 %v2259_v57  ;;  %v246_v56 = vld [vmem:[#allocation4 + $0x30] sm:$0xff] }
  0xea   :  { %477 = vmatpush.msrb.mxu0 %v2260_v48  ;;  %497 = vmatpush.msrb.mxu1 %v2261_v58 }
  0xeb   :  { %517 = vmatpush.msrb.mxu2 %v2262_v62  ;;  %537 = vmatpush.msrb.mxu3 %v2263_v61 }
 0x147   :  { %v265_v60 = vpop.f32.mrf.mxu0  ;;  %v285_v52 = vpop.f32.mrf.mxu1 }
 0x148   :  { %v328_v59 = vadd.f32 %v265_v60, %v244_v63  ;;  %v329_v53 = vadd.f32 %v285_v52, %v245_v51 }
 0x14a   :  { %v332_v55 = vmul.f32 0.5, %v328_v59  ;;  %v336_v54 = vmul.f32 0.5, %v329_v53 }
 0x14c   :  { %1076 = vtanh.f32 %v332_v55 }
 0x14d   :  { %1078 = vtanh.f32 %v336_v54 }
 0x14e   :  { %v305_v57 = vpop.f32.mrf.mxu2  ;;  %v325_v48 = vpop.f32.mrf.mxu3 }
 0x14f   :  { %v330_v47 = vadd.f32 %v305_v57, %v246_v56  ;;  %v331_v58 = vadd.f32 %v325_v48, %v247_v50  ;;  %v2270_v56 = vld [vmem:[#allocation19_spill] sm:$0xff]  ;;  %v2271_v57 = vld [vmem:[#allocation20_spill] sm:$0xff]  ;;  %v2272_v48 = vld [vmem:[#allocation25_spill] sm:$0xff] }
 0x151   :  { %1080 = vtanh.f32 %v330_v47  ;;  %v341_v62 = vmul.f32 0.5, %v331_v58  ;;  %v2273_v58 = vld [vmem:[#allocation22_spill] sm:$0xff] }
 0x152   :  { %v1077_v45 = vpop.eup %1076 }
 0x153   :  { %v1079_v61 = vpop.eup %1078  ;;  %v334_v44 = vadd.f32 1.0, %v1077_v45  ;;  %1082 = vtanh.f32 %v341_v62  ;;  %v2268_v45 = vld [vmem:[#allocation21_spill] sm:$0xff]  ;;  %v2274_v62 = vld [vmem:[#allocation23_spill] sm:$0xff] }
 0x154   :  { %v338_v43 = vadd.f32 1.0, %v1079_v61  ;;  %v2269_v61 = vld [vmem:[#allocation18_spill] sm:$0xff] }
 0x155   :  { %v335_v46 = vmul.f32 0.5, %v334_v44  ;;  %v2267_v44 = vld [vmem:[#allocation16_spill] sm:$0xff] }
 0x156   :  { %v339_v60 = vmul.f32 0.5, %v338_v43  ;;  %v2266_v43 = vld [vmem:[#allocation15_spill] sm:$0xff] }
 0x157   :  { %v1081_v63 = vpop.eup %1080 }
 0x158   :  { %v345_v59 = vmul.f32 %v339_v60, %v1675_v49  ;;  %v346_v55 = vmul.f32 %v1081_v63, %v335_v46  ;;  %v2264_v46 = vld [vmem:[#allocation17_spill] sm:$0xff]  ;;  %v2265_v49 = vld [vmem:[#allocation14_spill] sm:$0xff]  ;;  %v2275_v60 = vld [vmem:[#allocation24_spill] sm:$0xff] }
 0x159   :  { %v1083_v51 = vpop.eup %1082  ;;  %v2276_v63 = vld [vmem:[#allocation29_spill] sm:$0xff] }
 0x15a   :  { %v1743_v52 = vadd.f32 %v346_v55, %v345_v59  ;;  %v343_v53 = vadd.f32 1.0, %v1083_v51  ;;  %v2277_v59 = vld [vmem:[#allocation26_spill] sm:$0xff]  ;;  %v2278_v55 = vld [vmem:[#allocation27_spill] sm:$0xff]  ;;  %v2279_v51 = vld [vmem:[#allocation28_spill] sm:$0xff] }
 0x15c   :  { %1084 = vtanh.f32 %v1743_v52  ;;  %v344_v50 = vmul.f32 0.5, %v343_v53  ;;  %v2280_v53 = vld [vmem:[#allocation33_spill] sm:$0xff] }
 0x162   :  { %v1085_v47 = vpop.eup %1084 }
 0x163   :  { %v349_v54 = vmul.f32 %v1085_v47, %v344_v50  ;;  %v2281_v50 = vld [vmem:[#allocation30_spill] sm:$0xff]  ;;  %v2282_v47 = vld [vmem:[#allocation31_spill] sm:$0xff] }
 0x165   :  { %371 = vmatmul.f32.vlgmr.msra.gmra.mxu0 %v349_v54  ;;  %391 = vmatmul.f32.vlgmr.msra.gmra.mxu1 %v349_v54 }
 0x166   :  { %411 = vmatmul.f32.vlgmr.msra.gmra.mxu2 %v349_v54  ;;  %431 = vmatmul.f32.vlgmr.msra.gmra.mxu3 %v349_v54  ;;  %v2283_v54 = vld [vmem:[#allocation32_spill] sm:$0xff] }
 0x167   :  { %569 = vmatpush.msra.mxu0 %v1355_v0  ;;  %589 = vmatpush.msra.mxu1 %v1357_v1 }
 0x168   :  { %609 = vmatpush.msra.mxu2 %v1359_v2  ;;  %629 = vmatpush.msra.mxu3 %v1378_v9 }
 0x169   :  { %570 = vmatpush.msra.mxu0 %v1363_v3  ;;  %590 = vmatpush.msra.mxu1 %v1365_v4 }
 0x16a   :  { %610 = vmatpush.msra.mxu2 %v1367_v5  ;;  %630 = vmatpush.msra.mxu3 %v1386_v12 }
 0x16b   :  { %571 = vmatpush.msra.mxu0 %v1370_v6  ;;  %591 = vmatpush.msra.mxu1 %v1372_v7 }
 0x16c   :  { %611 = vmatpush.msra.mxu2 %v1376_v8  ;;  %631 = vmatpush.msra.mxu3 %v1392_v14 }
 0x16d   :  { %572 = vmatpush.msra.mxu0 %v1382_v10  ;;  %592 = vmatpush.msra.mxu1 %v1384_v11 }
 0x16e   :  { %612 = vmatpush.msra.mxu2 %v1390_v13  ;;  %632 = vmatpush.msra.mxu3 %v1404_v18 }
 0x16f   :  { %573 = vmatpush.msra.mxu0 %v1396_v15  ;;  %593 = vmatpush.msra.mxu1 %v1398_v16 }
 0x170   :  { %613 = vmatpush.msra.mxu2 %v1402_v17  ;;  %633 = vmatpush.msra.mxu3 %v1416_v22 }
 0x171   :  { %574 = vmatpush.msra.mxu0 %v1408_v19  ;;  %594 = vmatpush.msra.mxu1 %v1410_v20 }
 0x172   :  { %614 = vmatpush.msra.mxu2 %v1414_v21  ;;  %634 = vmatpush.msra.mxu3 %v1428_v26 }
 0x173   :  { %575 = vmatpush.msra.mxu0 %v1420_v23  ;;  %595 = vmatpush.msra.mxu1 %v1422_v24 }
 0x174   :  { %615 = vmatpush.msra.mxu2 %v1426_v25  ;;  %635 = vmatpush.msra.mxu3 %v1440_v30 }
 0x175   :  { %576 = vmatpush.msra.mxu0 %v1432_v27  ;;  %596 = vmatpush.msra.mxu1 %v1434_v28 }
 0x176   :  { %616 = vmatpush.msra.mxu2 %v1438_v29  ;;  %636 = vmatpush.msra.mxu3 %v1452_v34 }
 0x177   :  { %577 = vmatpush.msra.mxu0 %v1444_v31  ;;  %597 = vmatpush.msra.mxu1 %v1446_v32 }
 0x178   :  { %617 = vmatpush.msra.mxu2 %v1450_v33  ;;  %637 = vmatpush.msra.mxu3 %v1464_v38 }
 0x179   :  { %578 = vmatpush.msra.mxu0 %v1456_v35  ;;  %598 = vmatpush.msra.mxu1 %v1458_v36 }
 0x17a   :  { %618 = vmatpush.msra.mxu2 %v1462_v37  ;;  %638 = vmatpush.msra.mxu3 %v1476_v42 }
 0x17b   :  { %579 = vmatpush.msra.mxu0 %v1468_v39  ;;  %599 = vmatpush.msra.mxu1 %v1470_v40 }
 0x17c   :  { %619 = vmatpush.msra.mxu2 %v1474_v41  ;;  %639 = vmatpush.msra.mxu3 %v2264_v46 }
 0x17d   :  { %580 = vmatpush.msra.mxu0 %v2265_v49  ;;  %600 = vmatpush.msra.mxu1 %v2266_v43 }
 0x17e   :  { %620 = vmatpush.msra.mxu2 %v2267_v44  ;;  %640 = vmatpush.msra.mxu3 %v2268_v45 }
 0x17f   :  { %581 = vmatpush.msra.mxu0 %v2269_v61  ;;  %601 = vmatpush.msra.mxu1 %v2270_v56  ;;  %v354_v61 = vld [vmem:[#allocation4 + $0x58] sm:$0xff] }
 0x180   :  { %621 = vmatpush.msra.mxu2 %v2271_v57  ;;  %641 = vmatpush.msra.mxu3 %v2272_v48 }
 0x181   :  { %582 = vmatpush.msra.mxu0 %v2273_v58  ;;  %602 = vmatpush.msra.mxu1 %v2274_v62  ;;  %v2284_v58 = vld [vmem:[#allocation34_spill] sm:$0xff]  ;;  %v351_v62 = vld [vmem:[#allocation4 + $0x40] sm:$0xff] }
 0x182   :  { %622 = vmatpush.msra.mxu2 %v2275_v60  ;;  %642 = vmatpush.msra.mxu3 %v2276_v63  ;;  %v352_v60 = vld [vmem:[#allocation4 + $0x48] sm:$0xff] }
 0x183   :  { %583 = vmatpush.msra.mxu0 %v2277_v59  ;;  %603 = vmatpush.msra.mxu1 %v2278_v55 }
 0x184   :  { %623 = vmatpush.msra.mxu2 %v2279_v51  ;;  %643 = vmatpush.msra.mxu3 %v2280_v53  ;;  %v353_v51 = vld [vmem:[#allocation4 + $0x50] sm:$0xff] }
 0x185   :  { %584 = vmatpush.msra.mxu0 %v2281_v50  ;;  %604 = vmatpush.msra.mxu1 %v2282_v47 }
 0x186   :  { %624 = vmatpush.msra.mxu2 %v2283_v54  ;;  %644 = vmatpush.msra.mxu3 %v2284_v58 }
 0x1e2   :  { %v372_v48 = vpop.f32.mrf.mxu0  ;;  %v392_v63 = vpop.f32.mrf.mxu1 }
 0x1e3   :  { %v435_v57 = vadd.f32 %v372_v48, %v351_v62  ;;  %v436_v59 = vadd.f32 %v392_v63, %v352_v60 }
 0x1e5   :  { %v439_v56 = vmul.f32 0.5, %v435_v57  ;;  %v443_v55 = vmul.f32 0.5, %v436_v59 }
 0x1e7   :  { %1086 = vtanh.f32 %v439_v56 }
 0x1e8   :  { %1088 = vtanh.f32 %v443_v55 }
 0x1e9   :  { %v412_v53 = vpop.f32.mrf.mxu2  ;;  %v432_v50 = vpop.f32.mrf.mxu3 }
 0x1ea   :  { %v437_v45 = vadd.f32 %v412_v53, %v353_v51  ;;  %v438_v47 = vadd.f32 %v432_v50, %v354_v61  ;;  %v1882_v50 = vld [vmem:[#allocation7 + $0x1e0] sm:$0xff] }
 0x1ec   :  { %1090 = vtanh.f32 %v437_v45  ;;  %v448_v54 = vmul.f32 0.5, %v438_v47  ;;  %v1885_v47 = vld [vmem:[#allocation7 + $0x1e8] sm:$0xff] }
 0x1ed   :  { %v1087_v44 = vpop.eup %1086 }
 0x1ee   :  { %v1089_v58 = vpop.eup %1088  ;;  %v441_v43 = vadd.f32 1.0, %v1087_v44  ;;  %1092 = vtanh.f32 %v448_v54  ;;  %v1888_v54 = vld [vmem:[#allocation7 + $0x1f0] sm:$0xff] }
 0x1ef   :  { %v445_v49 = vadd.f32 1.0, %v1089_v58 }
 0x1f0   :  { %v442_v46 = vmul.f32 0.5, %v441_v43 }
 0x1f1   :  { %v446_v48 = vmul.f32 0.5, %v445_v49 }
 0x1f2   :  { %v1091_v62 = vpop.eup %1090 }
 0x1f3   :  { %v452_v57 = vmul.f32 %v446_v48, %v1743_v52  ;;  %v453_v56 = vmul.f32 %v1091_v62, %v442_v46  ;;  %v1891_v48 = vld [vmem:[#allocation7 + $0x1f8] sm:$0xff]  ;;  %v1894_v62 = vld [vmem:[#allocation7 + $0x1c0] sm:$0xff] }
 0x1f4   :  { %v1093_v60 = vpop.eup %1092 }
 0x1f5   :  { %v1811_v63 = vadd.f32 %v453_v56, %v452_v57  ;;  %v450_v59 = vadd.f32 1.0, %v1093_v60  ;;  %v1897_v57 = vld [vmem:[#allocation7 + $0x1c8] sm:$0xff]  ;;  %v1900_v56 = vld [vmem:[#allocation7 + $0x1d0] sm:$0xff]  ;;  %v1903_v60 = vld [vmem:[#allocation7 + $0x1d8] sm:$0xff] }
 0x1f7   :  { %1094 = vtanh.f32 %v1811_v63  ;;  %v451_v61 = vmul.f32 0.5, %v450_v59  ;;  %v1909_v59 = vld [vmem:[#allocation7 + $0x1a8] sm:$0xff] }
 0x1fd   :  { %v1095_v45 = vpop.eup %1094 }
 0x1fe   :  { %v456_v55 = vmul.f32 %v1095_v45, %v451_v61  ;;  %v1912_v61 = vld [vmem:[#allocation7 + $0x1b0] sm:$0xff]  ;;  %v1915_v45 = vld [vmem:[#allocation7 + $0x1b8] sm:$0xff] }
 0x200   :  { %478 = vmatmul.f32.vlgmr.msrb.gmra.mxu0 %v456_v55  ;;  %498 = vmatmul.f32.vlgmr.msrb.gmra.mxu1 %v456_v55 }
 0x201   :  { %518 = vmatmul.f32.vlgmr.msrb.gmra.mxu2 %v456_v55  ;;  %538 = vmatmul.f32.vlgmr.msrb.gmra.mxu3 %v456_v55  ;;  %v1918_v55 = vld [vmem:[#allocation7 + $0x180] sm:$0xff] }
 0x202   :  { %676 = vmatpush.msrb.mxu0 %v1355_v0  ;;  %696 = vmatpush.msrb.mxu1 %v1357_v1  ;;  %v2285_v0 = vld [vmem:[#allocation17_spill] sm:$0xff]  ;;  %v2286_v1 = vld [vmem:[#allocation14_spill] sm:$0xff] }
 0x203   :  { %716 = vmatpush.msrb.mxu2 %v1359_v2  ;;  %736 = vmatpush.msrb.mxu3 %v1378_v9  ;;  %v2287_v2 = vld [vmem:[#allocation15_spill] sm:$0xff]  ;;  %v2294_v9 = vld [vmem:[#allocation22_spill] sm:$0xff] }
 0x204   :  { %677 = vmatpush.msrb.mxu0 %v1363_v3  ;;  %697 = vmatpush.msrb.mxu1 %v1365_v4  ;;  %v2288_v3 = vld [vmem:[#allocation16_spill] sm:$0xff]  ;;  %v2289_v4 = vld [vmem:[#allocation21_spill] sm:$0xff] }
 0x205   :  { %717 = vmatpush.msrb.mxu2 %v1367_v5  ;;  %737 = vmatpush.msrb.mxu3 %v1386_v12  ;;  %v2290_v5 = vld [vmem:[#allocation18_spill] sm:$0xff]  ;;  %v2297_v12 = vld [vmem:[#allocation29_spill] sm:$0xff] }
 0x206   :  { %678 = vmatpush.msrb.mxu0 %v1370_v6  ;;  %698 = vmatpush.msrb.mxu1 %v1372_v7  ;;  %v2291_v6 = vld [vmem:[#allocation19_spill] sm:$0xff]  ;;  %v2292_v7 = vld [vmem:[#allocation20_spill] sm:$0xff] }
 0x207   :  { %718 = vmatpush.msrb.mxu2 %v1376_v8  ;;  %738 = vmatpush.msrb.mxu3 %v1392_v14  ;;  %v2293_v8 = vld [vmem:[#allocation25_spill] sm:$0xff]  ;;  %v2299_v14 = vld [vmem:[#allocation27_spill] sm:$0xff] }
 0x208   :  { %679 = vmatpush.msrb.mxu0 %v1382_v10  ;;  %699 = vmatpush.msrb.mxu1 %v1384_v11  ;;  %v2295_v10 = vld [vmem:[#allocation23_spill] sm:$0xff]  ;;  %v2296_v11 = vld [vmem:[#allocation24_spill] sm:$0xff] }
 0x209   :  { %719 = vmatpush.msrb.mxu2 %v1390_v13  ;;  %739 = vmatpush.msrb.mxu3 %v1404_v18  ;;  %v2298_v13 = vld [vmem:[#allocation26_spill] sm:$0xff]  ;;  %v2303_v18 = vld [vmem:[#allocation31_spill] sm:$0xff] }
 0x20a   :  { %680 = vmatpush.msrb.mxu0 %v1396_v15  ;;  %700 = vmatpush.msrb.mxu1 %v1398_v16  ;;  %v2300_v15 = vld [vmem:[#allocation28_spill] sm:$0xff]  ;;  %v2301_v16 = vld [vmem:[#allocation33_spill] sm:$0xff] }
 0x20b   :  { %720 = vmatpush.msrb.mxu2 %v1402_v17  ;;  %740 = vmatpush.msrb.mxu3 %v1416_v22  ;;  %v2302_v17 = vld [vmem:[#allocation30_spill] sm:$0xff] }
 0x20c   :  { %681 = vmatpush.msrb.mxu0 %v1408_v19  ;;  %701 = vmatpush.msrb.mxu1 %v1410_v20  ;;  %v2304_v19 = vld [vmem:[#allocation32_spill] sm:$0xff]  ;;  %v2305_v20 = vld [vmem:[#allocation34_spill] sm:$0xff] }
 0x20d   :  { %721 = vmatpush.msrb.mxu2 %v1414_v21  ;;  %741 = vmatpush.msrb.mxu3 %v1428_v26  ;;  %v458_v21 = vld [vmem:[#allocation4 + $0x60] sm:$0xff]  ;;  %v459_v22 = vld [vmem:[#allocation4 + $0x68] sm:$0xff] }
 0x20e   :  { %682 = vmatpush.msrb.mxu0 %v1420_v23  ;;  %702 = vmatpush.msrb.mxu1 %v1422_v24 }
 0x20f   :  { %722 = vmatpush.msrb.mxu2 %v1426_v25  ;;  %742 = vmatpush.msrb.mxu3 %v1440_v30  ;;  %v461_v30 = vld [vmem:[#allocation4 + $0x78] sm:$0xff] }
 0x210   :  { %683 = vmatpush.msrb.mxu0 %v1432_v27  ;;  %703 = vmatpush.msrb.mxu1 %v1434_v28 }
 0x211   :  { %723 = vmatpush.msrb.mxu2 %v1438_v29  ;;  %743 = vmatpush.msrb.mxu3 %v1452_v34  ;;  %v460_v29 = vld [vmem:[#allocation4 + $0x70] sm:$0xff] }
 0x212   :  { %684 = vmatpush.msrb.mxu0 %v1444_v31  ;;  %704 = vmatpush.msrb.mxu1 %v1446_v32 }
 0x213   :  { %724 = vmatpush.msrb.mxu2 %v1450_v33  ;;  %744 = vmatpush.msrb.mxu3 %v1464_v38 }
 0x214   :  { %685 = vmatpush.msrb.mxu0 %v1456_v35  ;;  %705 = vmatpush.msrb.mxu1 %v1458_v36 }
 0x215   :  { %725 = vmatpush.msrb.mxu2 %v1462_v37  ;;  %745 = vmatpush.msrb.mxu3 %v1476_v42 }
 0x216   :  { %686 = vmatpush.msrb.mxu0 %v1468_v39  ;;  %706 = vmatpush.msrb.mxu1 %v1470_v40 }
 0x217   :  { %726 = vmatpush.msrb.mxu2 %v1474_v41  ;;  %746 = vmatpush.msrb.mxu3 %v2285_v0  ;;  %v1921_v0 = vld [vmem:[#allocation7 + $0x188] sm:$0xff] }
 0x218   :  { %687 = vmatpush.msrb.mxu0 %v2286_v1  ;;  %707 = vmatpush.msrb.mxu1 %v2287_v2  ;;  %v1924_v1 = vld [vmem:[#allocation7 + $0x190] sm:$0xff]  ;;  %v1927_v2 = vld [vmem:[#allocation7 + $0x198] sm:$0xff] }
 0x219   :  { %727 = vmatpush.msrb.mxu2 %v2288_v3  ;;  %747 = vmatpush.msrb.mxu3 %v2289_v4  ;;  %v1930_v3 = vld [vmem:[#allocation7 + $0x160] sm:$0xff]  ;;  %v1933_v4 = vld [vmem:[#allocation7 + $0x168] sm:$0xff] }
 0x21a   :  { %688 = vmatpush.msrb.mxu0 %v2290_v5  ;;  %708 = vmatpush.msrb.mxu1 %v2291_v6  ;;  %v1936_v5 = vld [vmem:[#allocation7 + $0x170] sm:$0xff]  ;;  %v1939_v6 = vld [vmem:[#allocation7 + $0x178] sm:$0xff] }
 0x21b   :  { %728 = vmatpush.msrb.mxu2 %v2292_v7  ;;  %748 = vmatpush.msrb.mxu3 %v2293_v8  ;;  %v1942_v7 = vld [vmem:[#allocation7 + $0x140] sm:$0xff]  ;;  %v1945_v8 = vld [vmem:[#allocation7 + $0x148] sm:$0xff] }
 0x21c   :  { %689 = vmatpush.msrb.mxu0 %v2294_v9  ;;  %709 = vmatpush.msrb.mxu1 %v2295_v10  ;;  %v1948_v9 = vld [vmem:[#allocation7 + $0x150] sm:$0xff]  ;;  %v1951_v10 = vld [vmem:[#allocation7 + $0x158] sm:$0xff] }
 0x21d   :  { %729 = vmatpush.msrb.mxu2 %v2296_v11  ;;  %749 = vmatpush.msrb.mxu3 %v2297_v12  ;;  %v1954_v11 = vld [vmem:[#allocation7 + $0x120] sm:$0xff]  ;;  %v1957_v12 = vld [vmem:[#allocation7 + $0x128] sm:$0xff] }
 0x21e   :  { %690 = vmatpush.msrb.mxu0 %v2298_v13  ;;  %710 = vmatpush.msrb.mxu1 %v2299_v14  ;;  %v1960_v13 = vld [vmem:[#allocation7 + $0x130] sm:$0xff]  ;;  %v1963_v14 = vld [vmem:[#allocation7 + $0x138] sm:$0xff] }
 0x21f   :  { %730 = vmatpush.msrb.mxu2 %v2300_v15  ;;  %750 = vmatpush.msrb.mxu3 %v2301_v16  ;;  %v1966_v15 = vld [vmem:[#allocation7 + $0x100] sm:$0xff]  ;;  %v1969_v16 = vld [vmem:[#allocation7 + $0x108] sm:$0xff] }
 0x220   :  { %691 = vmatpush.msrb.mxu0 %v2302_v17  ;;  %711 = vmatpush.msrb.mxu1 %v2303_v18  ;;  %v1972_v17 = vld [vmem:[#allocation7 + $0x110] sm:$0xff]  ;;  %v1975_v18 = vld [vmem:[#allocation7 + $0x118] sm:$0xff] }
 0x221   :  { %731 = vmatpush.msrb.mxu2 %v2304_v19  ;;  %751 = vmatpush.msrb.mxu3 %v2305_v20  ;;  %v1978_v19 = vld [vmem:[#allocation7 + $0xe0] sm:$0xff]  ;;  %v1981_v20 = vld [vmem:[#allocation7 + $0xe8] sm:$0xff] }
 0x27d   :  { %v479_v23 = vpop.f32.mrf.mxu0  ;;  %v499_v24 = vpop.f32.mrf.mxu1 }
 0x27e   :  { %v542_v25 = vadd.f32 %v479_v23, %v458_v21  ;;  %v543_v26 = vadd.f32 %v499_v24, %v459_v22  ;;  %v1984_v21 = vld [vmem:[#allocation7 + $0xf0] sm:$0xff]  ;;  %v1987_v22 = vld [vmem:[#allocation7 + $0xf8] sm:$0xff]  ;;  %v1990_v23 = vld [vmem:[#allocation7 + $0xc0] sm:$0xff] }
 0x27f   :  { %v1993_v24 = vld [vmem:[#allocation7 + $0xc8] sm:$0xff] }
 0x280   :  { %v546_v27 = vmul.f32 0.5, %v542_v25  ;;  %v550_v28 = vmul.f32 0.5, %v543_v26  ;;  %v1996_v25 = vld [vmem:[#allocation7 + $0xd0] sm:$0xff]  ;;  %v1999_v26 = vld [vmem:[#allocation7 + $0xd8] sm:$0xff] }
 0x282   :  { %1096 = vtanh.f32 %v546_v27  ;;  %v2002_v27 = vld [vmem:[#allocation7 + $0xa0] sm:$0xff] }
 0x283   :  { %1098 = vtanh.f32 %v550_v28  ;;  %v2005_v28 = vld [vmem:[#allocation7 + $0xa8] sm:$0xff] }
 0x284   :  { %v519_v31 = vpop.f32.mrf.mxu2  ;;  %v539_v32 = vpop.f32.mrf.mxu3 }
 0x285   :  { %v544_v33 = vadd.f32 %v519_v31, %v460_v29  ;;  %v545_v34 = vadd.f32 %v539_v32, %v461_v30  ;;  %v2008_v29 = vld [vmem:[#allocation7 + $0xb0] sm:$0xff]  ;;  %v2011_v30 = vld [vmem:[#allocation7 + $0xb8] sm:$0xff]  ;;  %v2014_v31 = vld [vmem:[#allocation7 + $0x80] sm:$0xff] }
 0x286   :  { %2306 = vst [vmem:[#allocation17_spill] sm:$0xff] %v2011_v30  ;;  %v2017_v32 = vld [vmem:[#allocation7 + $0x88] sm:$0xff] }
 0x287   :  { %1100 = vtanh.f32 %v544_v33  ;;  %v555_v35 = vmul.f32 0.5, %v545_v34  ;;  %2307 = vst [vmem:[#allocation14_spill] sm:$0xff] %v2014_v31  ;;  %v2020_v33 = vld [vmem:[#allocation7 + $0x90] sm:$0xff]  ;;  %v2023_v34 = vld [vmem:[#allocation7 + $0x98] sm:$0xff] }
 0x288   :  { %v1097_v36 = vpop.eup %1096  ;;  %2308 = vst [vmem:[#allocation15_spill] sm:$0xff] %v2017_v32 }
 0x289   :  { %v1099_v37 = vpop.eup %1098  ;;  %v548_v38 = vadd.f32 1.0, %v1097_v36  ;;  %1102 = vtanh.f32 %v555_v35  ;;  %2309 = vst [vmem:[#allocation16_spill] sm:$0xff] %v2020_v33  ;;  %v2026_v35 = vld [vmem:[#allocation7 + $0x60] sm:$0xff]  ;;  %v2029_v36 = vld [vmem:[#allocation7 + $0x68] sm:$0xff] }
 0x28a   :  { %v552_v39 = vadd.f32 1.0, %v1099_v37  ;;  %2310 = vst [vmem:[#allocation21_spill] sm:$0xff] %v2023_v34  ;;  %v2032_v37 = vld [vmem:[#allocation7 + $0x70] sm:$0xff] }
 0x28b   :  { %v549_v40 = vmul.f32 0.5, %v548_v38  ;;  %2311 = vst [vmem:[#allocation18_spill] sm:$0xff] %v2026_v35  ;;  %v2035_v38 = vld [vmem:[#allocation7 + $0x78] sm:$0xff] }
 0x28c   :  { %v553_v41 = vmul.f32 0.5, %v552_v39  ;;  %2312 = vst [vmem:[#allocation19_spill] sm:$0xff] %v2029_v36  ;;  %v2038_v39 = vld [vmem:[#allocation7 + $0x40] sm:$0xff] }
 0x28d   :  { %v1101_v42 = vpop.eup %1100  ;;  %2313 = vst [vmem:[#allocation20_spill] sm:$0xff] %v2032_v37 }
 0x28e   :  { %v559_v52 = vmul.f32 %v553_v41, %v1811_v63  ;;  %v560_v46 = vmul.f32 %v1101_v42, %v549_v40  ;;  %v1906_v63 = vld [vmem:[#allocation7 + $0x1a0] sm:$0xff]  ;;  %2314 = vst [vmem:[#allocation25_spill] sm:$0xff] %v2035_v38  ;;  %v2041_v40 = vld [vmem:[#allocation7 + $0x48] sm:$0xff]  ;;  %v2044_v41 = vld [vmem:[#allocation7 + $0x50] sm:$0xff] }
 0x28f   :  { %v1103_v49 = vpop.eup %1102  ;;  %2315 = vst [vmem:[#allocation22_spill] sm:$0xff] %v2038_v39  ;;  %v2047_v42 = vld [vmem:[#allocation7 + $0x58] sm:$0xff] }
 0x290   :  { %v1879_v43 = vadd.f32 %v560_v46, %v559_v52  ;;  %v557_v44 = vadd.f32 1.0, %v1103_v49  ;;  %2316 = vst [vmem:[#allocation23_spill] sm:$0xff] %v2041_v40  ;;  %v2050_v52 = vld [vmem:[#allocation7 + $0x20] sm:$0xff]  ;;  %v2053_v46 = vld [vmem:[#allocation7 + $0x28] sm:$0xff]  ;;  %v2056_v49 = vld [vmem:[#allocation7 + $0x30] sm:$0xff] }
 0x291   :  { %2317 = vst [vmem:[#allocation24_spill] sm:$0xff] %v2044_v41 }
 0x292   :  { %1104 = vtanh.f32 %v1879_v43  ;;  %v558_v58 = vmul.f32 0.5, %v557_v44  ;;  %2318 = vst [vmem:[#allocation29_spill] sm:$0xff] %v2047_v42  ;;  %v2059_v44 = vld [vmem:[#allocation7 + $0x38] sm:$0xff] }
 0x293   :  { %2319 = vst [vmem:[#allocation26_spill] sm:$0xff] %v2050_v52 }
 0x294   :  { %2320 = vst [vmem:[#allocation27_spill] sm:$0xff] %v2053_v46 }
 0x295   :  { %2321 = vst [vmem:[#allocation28_spill] sm:$0xff] %v2056_v49 }
 0x296   :  { %2322 = vst [vmem:[#allocation33_spill] sm:$0xff] %v2059_v44 }
 0x298   :  { %v1105_v51 = vpop.eup %1104 }
 0x299   :  { %v563_v53 = vmul.f32 %v1105_v51, %v558_v58  ;;  %v2062_v58 = vld [vmem:[#allocation7] sm:$0xff]  ;;  %v2065_v51 = vld [vmem:[#allocation7 + $0x8] sm:$0xff] }
 0x29a   :  { %2323 = vst [vmem:[#allocation30_spill] sm:$0xff] %v2062_v58 }
 0x29b   :  { %585 = vmatmul.f32.vlgmr.msra.gmra.mxu0 %v563_v53  ;;  %605 = vmatmul.f32.vlgmr.msra.gmra.mxu1 %v563_v53  ;;  %2324 = vst [vmem:[#allocation31_spill] sm:$0xff] %v2065_v51 }
 0x29c   :  { %625 = vmatmul.f32.vlgmr.msra.gmra.mxu2 %v563_v53  ;;  %645 = vmatmul.f32.vlgmr.msra.gmra.mxu3 %v563_v53  ;;  %v2068_v53 = vld [vmem:[#allocation7 + $0x10] sm:$0xff] }
 0x29d   :  { %783 = vmatpush.msra.mxu0 %v1882_v50  ;;  %803 = vmatpush.msra.mxu1 %v1885_v47  ;;  %2325 = vst [vmem:[#allocation32_spill] sm:$0xff] %v2068_v53 }
 0x29e   :  { %823 = vmatpush.msra.mxu2 %v1888_v54  ;;  %843 = vmatpush.msra.mxu3 %v1891_v48 }
 0x29f   :  { %784 = vmatpush.msra.mxu0 %v1894_v62  ;;  %804 = vmatpush.msra.mxu1 %v1897_v57 }
 0x2a0   :  { %824 = vmatpush.msra.mxu2 %v1900_v56  ;;  %844 = vmatpush.msra.mxu3 %v1903_v60 }
 0x2a1   :  { %785 = vmatpush.msra.mxu0 %v1906_v63  ;;  %805 = vmatpush.msra.mxu1 %v1909_v59 }
 0x2a2   :  { %825 = vmatpush.msra.mxu2 %v1912_v61  ;;  %845 = vmatpush.msra.mxu3 %v1915_v45 }
 0x2a3   :  { %786 = vmatpush.msra.mxu0 %v1918_v55  ;;  %806 = vmatpush.msra.mxu1 %v1921_v0 }
 0x2a4   :  { %826 = vmatpush.msra.mxu2 %v1924_v1  ;;  %846 = vmatpush.msra.mxu3 %v1927_v2 }
 0x2a5   :  { %787 = vmatpush.msra.mxu0 %v1930_v3  ;;  %807 = vmatpush.msra.mxu1 %v1933_v4 }
 0x2a6   :  { %827 = vmatpush.msra.mxu2 %v1936_v5  ;;  %847 = vmatpush.msra.mxu3 %v1939_v6 }
 0x2a7   :  { %788 = vmatpush.msra.mxu0 %v1942_v7  ;;  %808 = vmatpush.msra.mxu1 %v1945_v8 }
 0x2a8   :  { %828 = vmatpush.msra.mxu2 %v1948_v9  ;;  %848 = vmatpush.msra.mxu3 %v1951_v10 }
 0x2a9   :  { %789 = vmatpush.msra.mxu0 %v1954_v11  ;;  %809 = vmatpush.msra.mxu1 %v1957_v12 }
 0x2aa   :  { %829 = vmatpush.msra.mxu2 %v1960_v13  ;;  %849 = vmatpush.msra.mxu3 %v1963_v14 }
 0x2ab   :  { %790 = vmatpush.msra.mxu0 %v1966_v15  ;;  %810 = vmatpush.msra.mxu1 %v1969_v16 }
 0x2ac   :  { %830 = vmatpush.msra.mxu2 %v1972_v17  ;;  %850 = vmatpush.msra.mxu3 %v1975_v18 }
 0x2ad   :  { %791 = vmatpush.msra.mxu0 %v1978_v19  ;;  %811 = vmatpush.msra.mxu1 %v1981_v20 }
 0x2ae   :  { %831 = vmatpush.msra.mxu2 %v1984_v21  ;;  %851 = vmatpush.msra.mxu3 %v1987_v22 }
 0x2af   :  { %792 = vmatpush.msra.mxu0 %v1990_v23  ;;  %812 = vmatpush.msra.mxu1 %v1993_v24 }
 0x2b0   :  { %832 = vmatpush.msra.mxu2 %v1996_v25  ;;  %852 = vmatpush.msra.mxu3 %v1999_v26 }
 0x2b1   :  { %793 = vmatpush.msra.mxu0 %v2002_v27  ;;  %813 = vmatpush.msra.mxu1 %v2005_v28 }
 0x2b2   :  { %833 = vmatpush.msra.mxu2 %v2008_v29  ;;  %853 = vmatpush.msra.mxu3 %v2011_v30 }
 0x2b3   :  { %794 = vmatpush.msra.mxu0 %v2014_v31  ;;  %814 = vmatpush.msra.mxu1 %v2017_v32 }
 0x2b4   :  { %834 = vmatpush.msra.mxu2 %v2020_v33  ;;  %854 = vmatpush.msra.mxu3 %v2023_v34 }
 0x2b5   :  { %795 = vmatpush.msra.mxu0 %v2026_v35  ;;  %815 = vmatpush.msra.mxu1 %v2029_v36 }
 0x2b6   :  { %835 = vmatpush.msra.mxu2 %v2032_v37  ;;  %855 = vmatpush.msra.mxu3 %v2035_v38  ;;  %v567_v38 = vld [vmem:[#allocation4 + $0x90] sm:$0xff]  ;;  %v568_v37 = vld [vmem:[#allocation4 + $0x98] sm:$0xff] }
 0x2b7   :  { %796 = vmatpush.msra.mxu0 %v2038_v39  ;;  %816 = vmatpush.msra.mxu1 %v2041_v40 }
 0x2b8   :  { %836 = vmatpush.msra.mxu2 %v2044_v41  ;;  %856 = vmatpush.msra.mxu3 %v2047_v42 }
 0x2b9   :  { %797 = vmatpush.msra.mxu0 %v2050_v52  ;;  %817 = vmatpush.msra.mxu1 %v2053_v46  ;;  %v2071_v46 = vld [vmem:[#allocation7 + $0x18] sm:$0xff]  ;;  %v566_v52 = vld [vmem:[#allocation4 + $0x88] sm:$0xff] }
 0x2ba   :  { %837 = vmatpush.msra.mxu2 %v2056_v49  ;;  %857 = vmatpush.msra.mxu3 %v2059_v44  ;;  %2326 = vst [vmem:[#allocation34_spill] sm:$0xff] %v2071_v46  ;;  %v565_v49 = vld [vmem:[#allocation4 + $0x80] sm:$0xff] }
 0x2bb   :  { %798 = vmatpush.msra.mxu0 %v2062_v58  ;;  %818 = vmatpush.msra.mxu1 %v2065_v51 }
 0x2bc   :  { %838 = vmatpush.msra.mxu2 %v2068_v53  ;;  %858 = vmatpush.msra.mxu3 %v2071_v46 }
 0x318   :  { %v586_v42 = vpop.f32.mrf.mxu0  ;;  %v606_v44 = vpop.f32.mrf.mxu1 }
 0x319   :  { %v649_v41 = vadd.f32 %v586_v42, %v565_v49  ;;  %v650_v40 = vadd.f32 %v606_v44, %v566_v52 }
 0x31b   :  { %v653_v39 = vmul.f32 0.5, %v649_v41  ;;  %v657_v58 = vmul.f32 0.5, %v650_v40 }
 0x31d   :  { %1106 = vtanh.f32 %v653_v39 }
 0x31e   :  { %1108 = vtanh.f32 %v657_v58  ;;  %v779_v58 = vld [vmem:[#allocation4 + $0xc0] sm:$0xff] }
 0x31f   :  { %v626_v51 = vpop.f32.mrf.mxu2  ;;  %v646_v36 = vpop.f32.mrf.mxu3 }
 0x320   :  { %v651_v35 = vadd.f32 %v626_v51, %v567_v38  ;;  %v652_v53 = vadd.f32 %v646_v36, %v568_v37  ;;  %v780_v51 = vld [vmem:[#allocation4 + $0xc8] sm:$0xff] }
 0x322   :  { %1110 = vtanh.f32 %v651_v35  ;;  %v662_v34 = vmul.f32 0.5, %v652_v53  ;;  %v1012_v53 = vld [vmem:[#allocation9 + $0x78] sm:$0xff] }
 0x323   :  { %v1107_v33 = vpop.eup %1106 }
 0x324   :  { %v1109_v46 = vpop.eup %1108  ;;  %v655_v32 = vadd.f32 1.0, %v1107_v33  ;;  %1112 = vtanh.f32 %v662_v34 }
 0x325   :  { %v659_v31 = vadd.f32 1.0, %v1109_v46 }
 0x326   :  { %v656_v30 = vmul.f32 0.5, %v655_v32 }
 0x327   :  { %v660_v42 = vmul.f32 0.5, %v659_v31 }
 0x328   :  { %v1111_v52 = vpop.eup %1110 }
 0x329   :  { %v666_v40 = vmul.f32 %v660_v42, %v1879_v43  ;;  %v667_v39 = vmul.f32 %v1111_v52, %v656_v30  ;;  %v2327_v43 = vld [vmem:[#allocation17_spill] sm:$0xff] }
 0x32a   :  { %v1113_v41 = vpop.eup %1112 }
 0x32b   :  { %v2075_v49 = vadd.f32 %v667_v39, %v666_v40  ;;  %v664_v38 = vadd.f32 1.0, %v1113_v41 }
 0x32d   :  { %1114 = vtanh.f32 %v2075_v49  ;;  %v665_v36 = vmul.f32 0.5, %v664_v38  ;;  %v781_v38 = vld [vmem:[#allocation4 + $0xd0] sm:$0xff] }
 0x333   :  { %v1115_v35 = vpop.eup %1114 }
 0x334   :  { %v670_v37 = vmul.f32 %v1115_v35, %v665_v36  ;;  %v782_v36 = vld [vmem:[#allocation4 + $0xd8] sm:$0xff] }
 0x336   :  { %692 = vmatmul.f32.vlgmr.msrb.gmra.mxu0 %v670_v37  ;;  %712 = vmatmul.f32.vlgmr.msrb.gmra.mxu1 %v670_v37 }
 0x337   :  { %732 = vmatmul.f32.vlgmr.msrb.gmra.mxu2 %v670_v37  ;;  %752 = vmatmul.f32.vlgmr.msrb.gmra.mxu3 %v670_v37 }
 0x338   :  { %890 = vmatpush.msrb.mxu0 %v1882_v50  ;;  %910 = vmatpush.msrb.mxu1 %v1885_v47  ;;  %v2328_v50 = vld [vmem:[#allocation14_spill] sm:$0xff]  ;;  %v2329_v47 = vld [vmem:[#allocation15_spill] sm:$0xff] }
 0x339   :  { %930 = vmatpush.msrb.mxu2 %v1888_v54  ;;  %950 = vmatpush.msrb.mxu3 %v1891_v48  ;;  %v2330_v54 = vld [vmem:[#allocation16_spill] sm:$0xff]  ;;  %v2331_v48 = vld [vmem:[#allocation21_spill] sm:$0xff] }
 0x33a   :  { %891 = vmatpush.msrb.mxu0 %v1894_v62  ;;  %911 = vmatpush.msrb.mxu1 %v1897_v57  ;;  %v2332_v62 = vld [vmem:[#allocation18_spill] sm:$0xff]  ;;  %v2333_v57 = vld [vmem:[#allocation19_spill] sm:$0xff] }
 0x33b   :  { %931 = vmatpush.msrb.mxu2 %v1900_v56  ;;  %951 = vmatpush.msrb.mxu3 %v1903_v60  ;;  %v2334_v56 = vld [vmem:[#allocation20_spill] sm:$0xff]  ;;  %v2335_v60 = vld [vmem:[#allocation25_spill] sm:$0xff] }
 0x33c   :  { %892 = vmatpush.msrb.mxu0 %v1906_v63  ;;  %912 = vmatpush.msrb.mxu1 %v1909_v59  ;;  %v2336_v63 = vld [vmem:[#allocation22_spill] sm:$0xff]  ;;  %v2337_v59 = vld [vmem:[#allocation23_spill] sm:$0xff] }
 0x33d   :  { %932 = vmatpush.msrb.mxu2 %v1912_v61  ;;  %952 = vmatpush.msrb.mxu3 %v1915_v45  ;;  %v2338_v61 = vld [vmem:[#allocation24_spill] sm:$0xff]  ;;  %v2339_v45 = vld [vmem:[#allocation29_spill] sm:$0xff] }
 0x33e   :  { %893 = vmatpush.msrb.mxu0 %v1918_v55  ;;  %913 = vmatpush.msrb.mxu1 %v1921_v0  ;;  %v2340_v55 = vld [vmem:[#allocation26_spill] sm:$0xff]  ;;  %v2341_v0 = vld [vmem:[#allocation27_spill] sm:$0xff] }
 0x33f   :  { %933 = vmatpush.msrb.mxu2 %v1924_v1  ;;  %953 = vmatpush.msrb.mxu3 %v1927_v2  ;;  %v2342_v1 = vld [vmem:[#allocation28_spill] sm:$0xff]  ;;  %v2343_v2 = vld [vmem:[#allocation33_spill] sm:$0xff] }
 0x340   :  { %894 = vmatpush.msrb.mxu0 %v1930_v3  ;;  %914 = vmatpush.msrb.mxu1 %v1933_v4  ;;  %v2344_v3 = vld [vmem:[#allocation30_spill] sm:$0xff]  ;;  %v2345_v4 = vld [vmem:[#allocation31_spill] sm:$0xff] }
 0x341   :  { %934 = vmatpush.msrb.mxu2 %v1936_v5  ;;  %954 = vmatpush.msrb.mxu3 %v1939_v6  ;;  %v2346_v5 = vld [vmem:[#allocation32_spill] sm:$0xff]  ;;  %v2347_v6 = vld [vmem:[#allocation34_spill] sm:$0xff] }
 0x342   :  { %895 = vmatpush.msrb.mxu0 %v1942_v7  ;;  %915 = vmatpush.msrb.mxu1 %v1945_v8  ;;  %v672_v7 = vld [vmem:[#allocation4 + $0xa0] sm:$0xff]  ;;  %v673_v8 = vld [vmem:[#allocation4 + $0xa8] sm:$0xff] }
 0x343   :  { %935 = vmatpush.msrb.mxu2 %v1948_v9  ;;  %955 = vmatpush.msrb.mxu3 %v1951_v10 }
 0x344   :  { %896 = vmatpush.msrb.mxu0 %v1954_v11  ;;  %916 = vmatpush.msrb.mxu1 %v1957_v12 }
 0x345   :  { %936 = vmatpush.msrb.mxu2 %v1960_v13  ;;  %956 = vmatpush.msrb.mxu3 %v1963_v14 }
 0x346   :  { %897 = vmatpush.msrb.mxu0 %v1966_v15  ;;  %917 = vmatpush.msrb.mxu1 %v1969_v16  ;;  %v674_v15 = vld [vmem:[#allocation4 + $0xb0] sm:$0xff]  ;;  %v675_v16 = vld [vmem:[#allocation4 + $0xb8] sm:$0xff] }
 0x347   :  { %937 = vmatpush.msrb.mxu2 %v1972_v17  ;;  %957 = vmatpush.msrb.mxu3 %v1975_v18 }
 0x348   :  { %898 = vmatpush.msrb.mxu0 %v1978_v19  ;;  %918 = vmatpush.msrb.mxu1 %v1981_v20 }
 0x349   :  { %938 = vmatpush.msrb.mxu2 %v1984_v21  ;;  %958 = vmatpush.msrb.mxu3 %v1987_v22 }
 0x34a   :  { %899 = vmatpush.msrb.mxu0 %v1990_v23  ;;  %919 = vmatpush.msrb.mxu1 %v1993_v24 }
 0x34b   :  { %939 = vmatpush.msrb.mxu2 %v1996_v25  ;;  %959 = vmatpush.msrb.mxu3 %v1999_v26 }
 0x34c   :  { %900 = vmatpush.msrb.mxu0 %v2002_v27  ;;  %920 = vmatpush.msrb.mxu1 %v2005_v28 }
 0x34d   :  { %940 = vmatpush.msrb.mxu2 %v2008_v29  ;;  %960 = vmatpush.msrb.mxu3 %v2327_v43 }
 0x34e   :  { %901 = vmatpush.msrb.mxu0 %v2328_v50  ;;  %921 = vmatpush.msrb.mxu1 %v2329_v47 }
 0x34f   :  { %941 = vmatpush.msrb.mxu2 %v2330_v54  ;;  %961 = vmatpush.msrb.mxu3 %v2331_v48 }
 0x350   :  { %902 = vmatpush.msrb.mxu0 %v2332_v62  ;;  %922 = vmatpush.msrb.mxu1 %v2333_v57 }
 0x351   :  { %942 = vmatpush.msrb.mxu2 %v2334_v56  ;;  %962 = vmatpush.msrb.mxu3 %v2335_v60 }
 0x352   :  { %903 = vmatpush.msrb.mxu0 %v2336_v63  ;;  %923 = vmatpush.msrb.mxu1 %v2337_v59 }
 0x353   :  { %943 = vmatpush.msrb.mxu2 %v2338_v61  ;;  %963 = vmatpush.msrb.mxu3 %v2339_v45 }
 0x354   :  { %904 = vmatpush.msrb.mxu0 %v2340_v55  ;;  %924 = vmatpush.msrb.mxu1 %v2341_v0 }
 0x355   :  { %944 = vmatpush.msrb.mxu2 %v2342_v1  ;;  %964 = vmatpush.msrb.mxu3 %v2343_v2 }
 0x356   :  { %905 = vmatpush.msrb.mxu0 %v2344_v3  ;;  %925 = vmatpush.msrb.mxu1 %v2345_v4  ;;  %v1011_v4 = vld [vmem:[#allocation9 + $0x70] sm:$0xff] }
 0x357   :  { %945 = vmatpush.msrb.mxu2 %v2346_v5  ;;  %965 = vmatpush.msrb.mxu3 %v2347_v6  ;;  %v1010_v5 = vld [vmem:[#allocation9 + $0x68] sm:$0xff]  ;;  %v1009_v6 = vld [vmem:[#allocation9 + $0x60] sm:$0xff] }
 0x3b3   :  { %v693_v9 = vpop.f32.mrf.mxu0  ;;  %v713_v10 = vpop.f32.mrf.mxu1 }
 0x3b4   :  { %v756_v11 = vadd.f32 %v693_v9, %v672_v7  ;;  %v757_v12 = vadd.f32 %v713_v10, %v673_v8  ;;  %v1008_v7 = vld [vmem:[#allocation9 + $0x58] sm:$0xff]  ;;  %v1007_v8 = vld [vmem:[#allocation9 + $0x50] sm:$0xff]  ;;  %v1006_v9 = vld [vmem:[#allocation9 + $0x48] sm:$0xff] }
 0x3b5   :  { %v1005_v10 = vld [vmem:[#allocation9 + $0x40] sm:$0xff] }
 0x3b6   :  { %v760_v13 = vmul.f32 0.5, %v756_v11  ;;  %v764_v14 = vmul.f32 0.5, %v757_v12  ;;  %v1004_v11 = vld [vmem:[#allocation9 + $0x38] sm:$0xff]  ;;  %v1003_v12 = vld [vmem:[#allocation9 + $0x30] sm:$0xff] }
 0x3b8   :  { %1116 = vtanh.f32 %v760_v13  ;;  %v1002_v13 = vld [vmem:[#allocation9 + $0x28] sm:$0xff] }
 0x3b9   :  { %1118 = vtanh.f32 %v764_v14  ;;  %v1001_v14 = vld [vmem:[#allocation9 + $0x20] sm:$0xff] }
 0x3ba   :  { %v733_v17 = vpop.f32.mrf.mxu2  ;;  %v753_v18 = vpop.f32.mrf.mxu3 }
 0x3bb   :  { %v758_v19 = vadd.f32 %v733_v17, %v674_v15  ;;  %v759_v20 = vadd.f32 %v753_v18, %v675_v16  ;;  %v1000_v15 = vld [vmem:[#allocation9 + $0x18] sm:$0xff]  ;;  %v999_v16 = vld [vmem:[#allocation9 + $0x10] sm:$0xff]  ;;  %v998_v17 = vld [vmem:[#allocation9 + $0x8] sm:$0xff] }
 0x3bc   :  { %v997_v18 = vld [vmem:[#allocation9] sm:$0xff] }
 0x3bd   :  { %1120 = vtanh.f32 %v758_v19  ;;  %v769_v21 = vmul.f32 0.5, %v759_v20  ;;  %v886_v19 = vld [vmem:[#allocation4 + $0xe0] sm:$0xff]  ;;  %v887_v20 = vld [vmem:[#allocation4 + $0xe8] sm:$0xff] }
 0x3be   :  { %v1117_v22 = vpop.eup %1116 }
 0x3bf   :  { %v1119_v23 = vpop.eup %1118  ;;  %v762_v24 = vadd.f32 1.0, %v1117_v22  ;;  %1122 = vtanh.f32 %v769_v21 }
 0x3c0   :  { %v766_v25 = vadd.f32 1.0, %v1119_v23 }
 0x3c1   :  { %v763_v26 = vmul.f32 0.5, %v762_v24 }
 0x3c2   :  { %v767_v27 = vmul.f32 0.5, %v766_v25 }
 0x3c3   :  { %v1121_v28 = vpop.eup %1120 }
 0x3c4   :  { %v773_v29 = vmul.f32 %v767_v27, %v2075_v49  ;;  %v774_v30 = vmul.f32 %v1121_v28, %v763_v26  ;;  %v888_v27 = vld [vmem:[#allocation4 + $0xf0] sm:$0xff]  ;;  %v889_v28 = vld [vmem:[#allocation4 + $0xf8] sm:$0xff] }
 0x3c5   :  { %v1123_v31 = vpop.eup %1122 }
 0x3c6   :  { %v775_v32 = vadd.f32 %v774_v30, %v773_v29  ;;  %v771_v33 = vadd.f32 1.0, %v1123_v31 }
 0x3c8   :  { %1124 = vtanh.f32 %v775_v32  ;;  %v772_v34 = vmul.f32 0.5, %v771_v33 }
 0x3ce   :  { %v1125_v46 = vpop.eup %1124 }
 0x3cf   :  { %v777_v44 = vmul.f32 %v1125_v46, %v772_v34 }
 0x3d1   :  { %799 = vmatmul.f32.vlgmr.msra.gmra.mxu0 %v777_v44  ;;  %819 = vmatmul.f32.vlgmr.msra.gmra.mxu1 %v777_v44 }
 0x3d2   :  { %839 = vmatmul.f32.vlgmr.msra.gmra.mxu2 %v777_v44  ;;  %859 = vmatmul.f32.vlgmr.msra.gmra.mxu3 %v777_v44 }
 0x3d3   :  { %1017 = vmatpush.msra.mxu0 %v1012_v53 }
 0x3d5   :  { %1018 = vmatpush.msra.mxu0 %v1011_v4 }
 0x3d7   :  { %1019 = vmatpush.msra.mxu0 %v1010_v5 }
 0x3d9   :  { %1020 = vmatpush.msra.mxu0 %v1009_v6 }
 0x3db   :  { %1021 = vmatpush.msra.mxu0 %v1008_v7 }
 0x3dd   :  { %1022 = vmatpush.msra.mxu0 %v1007_v8 }
 0x3df   :  { %1023 = vmatpush.msra.mxu0 %v1006_v9 }
 0x3e1   :  { %1024 = vmatpush.msra.mxu0 %v1005_v10 }
 0x3e3   :  { %1025 = vmatpush.msra.mxu0 %v1004_v11 }
 0x3e5   :  { %1026 = vmatpush.msra.mxu0 %v1003_v12 }
 0x3e7   :  { %1027 = vmatpush.msra.mxu0 %v1002_v13 }
 0x3e9   :  { %1028 = vmatpush.msra.mxu0 %v1001_v14 }
 0x3eb   :  { %1029 = vmatpush.msra.mxu0 %v1000_v15 }
 0x3ed   :  { %1030 = vmatpush.msra.mxu0 %v999_v16 }
 0x3ef   :  { %1031 = vmatpush.msra.mxu0 %v998_v17 }
 0x3f1   :  { %1032 = vmatpush.msra.mxu0 %v997_v18 }
 0x44e   :  { %v800_v42 = vpop.f32.mrf.mxu0  ;;  %v820_v52 = vpop.f32.mrf.mxu1 }
 0x44f   :  { %v863_v40 = vadd.f32 %v800_v42, %v779_v58  ;;  %v864_v39 = vadd.f32 %v820_v52, %v780_v51 }
 0x451   :  { %v867_v41 = vmul.f32 0.5, %v863_v40  ;;  %v871_v49 = vmul.f32 0.5, %v864_v39 }
 0x453   :  { %1126 = vtanh.f32 %v867_v41 }
 0x454   :  { %1128 = vtanh.f32 %v871_v49 }
 0x455   :  { %v840_v35 = vpop.f32.mrf.mxu2  ;;  %v860_v37 = vpop.f32.mrf.mxu3 }
 0x456   :  { %v865_v43 = vadd.f32 %v840_v35, %v781_v38  ;;  %v866_v50 = vadd.f32 %v860_v37, %v782_v36  ;;  %v1065_v37 = vld [vmem:[%s2156_s3] ss:$0 sm:$0xff] }
 0x458   :  { %1130 = vtanh.f32 %v865_v43  ;;  %v876_v47 = vmul.f32 0.5, %v866_v50 }
 0x459   :  { %v1127_v54 = vpop.eup %1126 }
 0x45a   :  { %v1129_v48 = vpop.eup %1128  ;;  %v869_v62 = vadd.f32 1.0, %v1127_v54  ;;  %1132 = vtanh.f32 %v876_v47 }
 0x45b   :  { %v873_v57 = vadd.f32 1.0, %v1129_v48 }
 0x45c   :  { %v870_v56 = vmul.f32 0.5, %v869_v62 }
 0x45d   :  { %v874_v60 = vmul.f32 0.5, %v873_v57 }
 0x45e   :  { %v1131_v63 = vpop.eup %1130 }
 0x45f   :  { %v880_v59 = vmul.f32 %v874_v60, %v775_v32  ;;  %v881_v61 = vmul.f32 %v1131_v63, %v870_v56 }
 0x460   :  { %v1133_v45 = vpop.eup %1132 }
 0x461   :  { %v2143_v55 = vadd.f32 %v881_v61, %v880_v59  ;;  %v878_v0 = vadd.f32 1.0, %v1133_v45 }
 0x463   :  { %1134 = vtanh.f32 %v2143_v55  ;;  %v879_v1 = vmul.f32 0.5, %v878_v0 }
 0x469   :  { %v1135_v2 = vpop.eup %1134 }
 0x46a   :  { %v884_v3 = vmul.f32 %v1135_v2, %v879_v1 }
 0x46c   :  { %906 = vmatmul.f32.vlgmr.msrb.gmra.mxu0 %v884_v3  ;;  %926 = vmatmul.f32.vlgmr.msrb.gmra.mxu1 %v884_v3 }
 0x46d   :  { %946 = vmatmul.f32.vlgmr.msrb.gmra.mxu2 %v884_v3  ;;  %966 = vmatmul.f32.vlgmr.msrb.gmra.mxu3 %v884_v3 }
 0x4e9   :  { %v907_v21 = vpop.f32.mrf.mxu0  ;;  %v927_v22 = vpop.f32.mrf.mxu1 }
 0x4ea   :  { %v970_v23 = vadd.f32 %v907_v21, %v886_v19  ;;  %v971_v24 = vadd.f32 %v927_v22, %v887_v20 }
 0x4ec   :  { %v974_v25 = vmul.f32 0.5, %v970_v23  ;;  %v978_v26 = vmul.f32 0.5, %v971_v24 }
 0x4ee   :  { %1136 = vtanh.f32 %v974_v25 }
 0x4ef   :  { %1138 = vtanh.f32 %v978_v26 }
 0x4f0   :  { %v947_v29 = vpop.f32.mrf.mxu2  ;;  %v967_v30 = vpop.f32.mrf.mxu3 }
 0x4f1   :  { %v972_v31 = vadd.f32 %v947_v29, %v888_v27  ;;  %v973_v32 = vadd.f32 %v967_v30, %v889_v28 }
 0x4f3   :  { %1140 = vtanh.f32 %v972_v31  ;;  %v983_v33 = vmul.f32 0.5, %v973_v32 }
 0x4f4   :  { %v1137_v34 = vpop.eup %1136 }
 0x4f5   :  { %v1139_v46 = vpop.eup %1138  ;;  %v976_v44 = vadd.f32 1.0, %v1137_v34  ;;  %1142 = vtanh.f32 %v983_v33 }
 0x4f6   :  { %v980_v58 = vadd.f32 1.0, %v1139_v46 }
 0x4f7   :  { %v977_v51 = vmul.f32 0.5, %v976_v44 }
 0x4f8   :  { %v981_v53 = vmul.f32 0.5, %v980_v58 }
 0x4f9   :  { %v1141_v42 = vpop.eup %1140 }
 0x4fa   :  { %v987_v52 = vmul.f32 %v981_v53, %v2143_v55  ;;  %v988_v40 = vmul.f32 %v1141_v42, %v977_v51 }
 0x4fb   :  { %v1143_v39 = vpop.eup %1142 }
 0x4fc   :  { %v989_v41 = vadd.f32 %v988_v40, %v987_v52  ;;  %v985_v49 = vadd.f32 1.0, %v1143_v39 }
 0x4fe   :  { %1144 = vtanh.f32 %v989_v41  ;;  %v986_v38 = vmul.f32 0.5, %v985_v49 }
 0x504   :  { %v1145_v36 = vpop.eup %1144 }
 0x505   :  { %v991_v35 = vmul.f32 %v1145_v36, %v986_v38 }
 0x507   :  { %1033 = vmatmul.f32.vlgmr.msra.gmra.mxu0 %v991_v35 }
 0x584   :  { %v1034_v43 = vpop.f32.mrf.mxu0 }
 0x585   :  { %v1035_v50 = vadd.f32 %v1065_v37, %v1034_v43 }
 0x587   :  { %1037 = vst [vmem:[#allocation10] sm:$0xff] %v1035_v50 }
 0x588   :  { %1048 = dma.vmem_to_hbm [thread:$0]  %s1044_s8, 128, %s1046_s11, [#allocation6]  }
 0x589   :  { %1310 = dma.done.wait [#allocation6], 128  }
 0x58a   :  { %1311 = vsyncadd [#allocation6], 4294967168 }
 0x58b   :  { %1053 = vsyncpa [#allocation5], 1 }
 0x58c   :  { %1054 = vsyncpa [#allocation8], 1 }
 0x58d   :  { %1055 = vsyncpa [#allocation6], 1 }

</bundles_post_ra>
